<compile_context>
chip_gen: v5e
topology: v5e:2x2
jax: 0.10.0
libtpu: 0.0.40
codegen_flags: <defaults>
</compile_context>

<pallas_src>
import functools

import jax
import jax.numpy as jnp
from jax.experimental import pallas as pl
from jax.experimental.pallas import tpu as pltpu

_EPS = 1e-5
_LANE = 128
_VMEM_LIMIT = 32 * 1024 * 1024   # explicit scoped-VMEM budget (tiles sized well below it)

_MAX_TILE_ROWS_CACHE = None


def _round_up(x, m):
    return (x + m - 1) // m * m


def _max_tile_rows():
    """Generation-dependent row-tile cap: smaller on 64-MiB-VMEM chips (v7x)."""
    global _MAX_TILE_ROWS_CACHE
    if _MAX_TILE_ROWS_CACHE is None:
        rows = 1024
        try:
            vmem = pltpu.get_tpu_info().vmem_capacity_bytes
            if vmem <= 96 * 1024 * 1024:
                rows = 512
        except Exception:
            pass
        _MAX_TILE_ROWS_CACHE = rows
    return _MAX_TILE_ROWS_CACHE


def _pick_tile_h(Ho, Wo):
    """Largest divisor of Ho whose row tile (th*Wo) is sublane aligned and <= cap."""
    cap = _max_tile_rows()
    best = Ho                      # full extent is always legal
    for d in range(1, Ho + 1):
        if Ho % d == 0 and d * Wo <= cap and (d * Wo) % 8 == 0:
            best = d
    return best


# ----------------------------------------------------------------------------
# Weight packing: (O,I,3,3) -> (9, cin_in, cout_p[*2]) or flat (9*cin_in, ...)
# K order is (dy, dx, cin); the optional 1x1 projection conv rides on the
# centre tap of a second cout_p-wide output half (one fused MXU matmul).
# ----------------------------------------------------------------------------
def _pack_weights(w_oihw, cin_in, cout_p, wsc_oihw=None, flat=True):
    cout, cin = w_oihw.shape[0], w_oihw.shape[1]
    w = jnp.transpose(w_oihw.astype(jnp.float32), (2, 3, 1, 0)).reshape(9, cin, cout)
    w = jnp.pad(w, ((0, 0), (0, cin_in - cin), (0, cout_p - cout)))
    if wsc_oihw is not None:
        co, ci = wsc_oihw.shape[0], wsc_oihw.shape[1]
        wsc = jnp.transpose(wsc_oihw[:, :, 0, 0].astype(jnp.float32), (1, 0))
        wsc = jnp.pad(wsc, ((0, cin_in - ci), (0, cout_p - co)))
        wproj = jnp.zeros((9, cin_in, cout_p), jnp.float32).at[4].set(wsc)
        w = jnp.concatenate([w, wproj], axis=2)            # (9, cin_in, 2*cout_p)
    if flat:
        w = w.reshape(9 * cin_in, w.shape[2])
    return w.astype(jnp.bfloat16)


# ----------------------------------------------------------------------------
# Pass 1: 3x3 conv (+ fused 1x1 projection) (+ fused input BN+ReLU) + BN stats
# ----------------------------------------------------------------------------
def _conv_stats_kernel(th, Wo, Hin, Win, cout_p, has_proj, pre_bn,
                       from_packed, pack_in_kernel, *refs):
    idx = 0
    x_ref = refs[idx]; idx += 1
    w_ref = refs[idx]; idx += 1
    if pre_bn:
        psc_ref = refs[idx]; psh_ref = refs[idx + 1]; idx += 2
    raw_ref = refs[idx]; idx += 1
    if has_proj:
        scraw_ref = refs[idx]; idx += 1
    stats_ref = refs[idx]

    M = th * Wo

    if from_packed:
        # Pre-packed (M, 9*cin) bf16 operand (strided convs): single matmul.
        acc = jnp.dot(x_ref[0], w_ref[...], preferred_element_type=jnp.float32)
    else:
        cin = x_ref.shape[3]
        Wp = x_ref.shape[2]
        r0 = pl.program_id(1) * th
        # One haloed row-tile load; taps are value slices of it.
        halo = x_ref[0, pl.ds(r0, th + 2), :, :]           # (th+2, Wp, cin) bf16
        if pre_bn:
            # Fused BN1-apply + ReLU on conv2's input; mask restores the zero
            # border of the (logically) zero-padded h1.
            h = halo.astype(jnp.float32) * psc_ref[...] + psh_ref[...]
            h = jnp.maximum(h, 0.0)
            rows = jax.lax.broadcasted_iota(jnp.int32, (th + 2, Wp), 0) + r0
            cols = jax.lax.broadcasted_iota(jnp.int32, (th + 2, Wp), 1)
            valid = (rows >= 1) & (rows <= Hin) & (cols >= 1) & (cols <= Win)
            halo = jnp.where(valid[:, :, None], h, 0.0).astype(jnp.bfloat16)
        taps = [halo[dy:dy + th, dx:dx + Wo, :].reshape(M, cin)
                for dy in range(3) for dx in range(3)]
        if pack_in_kernel:
            # Lane-aligned cin: pack taps along K, one big MXU matmul.
            packed = jnp.concatenate(taps, axis=-1)        # (M, 9*cin) bf16
            acc = jnp.dot(packed, w_ref[...], preferred_element_type=jnp.float32)
        else:
            # Tiny / unaligned cin fallback: per-tap dots, value accumulation.
            acc = jnp.zeros((M, w_ref.shape[-1]), jnp.float32)
            for k, tap in enumerate(taps):
                acc = acc + jnp.dot(tap, w_ref[k], preferred_element_type=jnp.float32)

    conv = acc[:, :cout_p] if has_proj else acc
    raw_ref[0] = conv.astype(raw_ref.dtype)                # bf16 lane-dense store
    # BN partials from the f32 accumulator: per-tile sum and CENTERED sum-sq.
    s1 = jnp.sum(conv, axis=0, keepdims=True)
    d = conv - s1 * (1.0 / M)
    cs2 = jnp.sum(d * d, axis=0, keepdims=True)
    if has_proj:
        sc = acc[:, cout_p:]
        scraw_ref[0] = sc.astype(scraw_ref.dtype)
        p1 = jnp.sum(sc, axis=0, keepdims=True)
        dp = sc - p1 * (1.0 / M)
        pcs2 = jnp.sum(dp * dp, axis=0, keepdims=True)
        stats_ref[0, 0] = jnp.concatenate([s1, cs2, p1, pcs2], axis=0)
    else:
        stats_ref[0, 0] = jnp.concatenate([s1, cs2], axis=0)


def _conv3x3_bn_stats(x_nhwc, w_oihw, stride, cout_p, wsc_oihw=None,
                      pre_scale=None, pre_shift=None):
    """Tiled conv pass.  Returns raw bf16 (N, Ho*Wo, cout_p), optional projection
    raw, BN partials (N, HT, rows, cout_p) f32, and (Ho, Wo, th)."""
    N, H, W, cin = x_nhwc.shape
    Ho = (H + 2 - 3) // stride + 1
    Wo = (W + 2 - 3) // stride + 1
    th = _pick_tile_h(Ho, Wo)
    HT = Ho // th
    M = th * Wo

    has_proj = wsc_oihw is not None
    pre_bn = pre_scale is not None
    assert not (pre_bn and stride != 1)

    xp = jnp.pad(x_nhwc.astype(jnp.bfloat16), ((0, 0), (1, 1), (1, 1), (0, 0)))
    if stride == 1:
        from_packed = False
        pack_in_kernel = (cin % _LANE == 0)
        x_in = xp
        # TODO(synk): on 64-MiB-VMEM chips a haloed row-tile BlockSpec would be
        # preferable to the full resident padded image for very large maps.
        x_spec = pl.BlockSpec((1, H + 2, W + 2, cin), lambda n, t: (n, 0, 0, 0))
    else:
        # Strided convs: pack the (already subsampled) taps along K wrapper-side
        # so the kernel does a single matmul on a contiguous operand.
        from_packed = True
        pack_in_kernel = False
        taps = [xp[:, dy::stride, dx::stride, :][:, :Ho, :Wo, :].reshape(N, Ho * Wo, cin)
                for dy in range(3) for dx in range(3)]
        x_in = jnp.concatenate(taps, axis=-1)              # (N, Ho*Wo, 9*cin) bf16
        x_spec = pl.BlockSpec((1, M, 9 * cin), lambda n, t: (n, t, 0))

    flat_w = from_packed or pack_in_kernel
    w_packed = _pack_weights(w_oihw, cin, cout_p, wsc_oihw, flat=flat_w)
    w_spec = pl.BlockSpec(w_packed.shape, lambda n, t: (0,) * w_packed.ndim)

    in_specs = [x_spec, w_spec]
    args = [x_in, w_packed]
    if pre_bn:
        vec = pl.BlockSpec((1, cin), lambda n, t: (0, 0))
        in_specs += [vec, vec]
        args += [pre_scale.astype(jnp.float32), pre_shift.astype(jnp.float32)]

    tile_spec = pl.BlockSpec((1, M, cout_p), lambda n, t: (n, t, 0))
    out_shape = [jax.ShapeDtypeStruct((N, Ho * Wo, cout_p), jnp.bfloat16)]
    out_specs = [tile_spec]
    if has_proj:
        out_shape.append(jax.ShapeDtypeStruct((N, Ho * Wo, cout_p), jnp.bfloat16))
        out_specs.append(tile_spec)
    rows = 4 if has_proj else 2
    out_shape.append(jax.ShapeDtypeStruct((N, HT, rows, cout_p), jnp.float32))
    out_specs.append(pl.BlockSpec((1, 1, rows, cout_p), lambda n, t: (n, t, 0, 0)))

    kernel = functools.partial(_conv_stats_kernel, th, Wo, H, W, cout_p,
                               has_proj, pre_bn, from_packed, pack_in_kernel)
    outs = pl.pallas_call(
        kernel,
        grid=(N, HT),
        in_specs=in_specs,
        out_specs=tuple(out_specs),
        out_shape=tuple(out_shape),
        compiler_params=pltpu.CompilerParams(
            dimension_semantics=("parallel", "parallel"),
            vmem_limit_bytes=_VMEM_LIMIT),
    )(*args)

    if has_proj:
        raw, scraw, stats = outs
    else:
        (raw, stats), scraw = outs, None
    return raw, scraw, stats, (Ho, Wo, th)


# ----------------------------------------------------------------------------
# Global BN scale/shift from per-tile partials (pooled, centered variance)
# ----------------------------------------------------------------------------
def _pad_vec(v, n):
    return jnp.pad(v.astype(jnp.float32), (0, n - v.shape[0]))


def _bn_scale_shift(stats, row0, m_tile, count, gamma_p, beta_p):
    C = stats.shape[-1]
    s1 = stats[:, :, row0, :].reshape(-1, C)
    cs2 = stats[:, :, row0 + 1, :].reshape(-1, C)
    mean_t = s1 / m_tile
    mean = jnp.sum(s1, axis=0) / count
    var = (jnp.sum(cs2, axis=0)
           + m_tile * jnp.sum(jnp.square(mean_t - mean), axis=0)) / count
    var = jnp.maximum(var, 0.0)
    scale = gamma_p * jax.lax.rsqrt(var + _EPS)
    shift = beta_p - mean * scale
    return scale.reshape(1, -1), shift.reshape(1, -1)


# ----------------------------------------------------------------------------
# Pass 2: BN affine (+ shortcut add) (+ ReLU) epilogue (f32 math, bf16 stores)
# ----------------------------------------------------------------------------
def _bn_act_kernel(sc_mode, relu, raw_ref, scale_ref, shift_ref, *rest):
    if sc_mode == "none":
        (out_ref,) = rest
        sc_ref = sc_scale_ref = sc_shift_ref = None
    elif sc_mode == "identity":
        sc_ref, out_ref = rest
        sc_scale_ref = sc_shift_ref = None
    else:  # "proj"
        sc_ref, sc_scale_ref, sc_shift_ref, out_ref = rest

    y = raw_ref[0].astype(jnp.float32) * scale_ref[...] + shift_ref[...]
    if sc_mode == "identity":
        y = y + sc_ref[0].astype(jnp.float32)
    elif sc_mode == "proj":
        y = y + (sc_ref[0].astype(jnp.float32) * sc_scale_ref[...] + sc_shift_ref[...])
    if relu:
        y = jnp.maximum(y, 0.0)
    out_ref[0] = y.astype(out_ref.dtype)


def _bn_act_call(raw, scale, shift, *, sc_mode, relu, out_dtype, th, Wo,
                 sc=None, sc_scale=None, sc_shift=None):
    N, Mtot, C = raw.shape
    M = th * Wo
    HT = Mtot // M
    tile = pl.BlockSpec((1, M, C), lambda n, t: (n, t, 0))
    vec = pl.BlockSpec((1, C), lambda n, t: (0, 0))
    in_specs = [tile, vec, vec]
    args = [raw, scale, shift]
    if sc_mode == "identity":
        in_specs.append(tile)
        args.append(sc)
    elif sc_mode == "proj":
        in_specs += [tile, vec, vec]
        args += [sc, sc_scale, sc_shift]
    kernel = functools.partial(_bn_act_kernel, sc_mode, relu)
    return pl.pallas_call(
        kernel,
        grid=(N, HT),
        in_specs=in_specs,
        out_specs=tile,
        out_shape=jax.ShapeDtypeStruct((N, Mtot, C), out_dtype),
        compiler_params=pltpu.CompilerParams(
            dimension_semantics=("parallel", "parallel"),
            vmem_limit_bytes=_VMEM_LIMIT),
    )(*args)


# ----------------------------------------------------------------------------
# BasicBlock and stem built from the two fused kernels
# ----------------------------------------------------------------------------
def _basic_block_nhwc(x, params, stride):
    """x: NHWC (channels possibly already lane-padded with zeros).
    Returns NHWC bf16 with cout_p (lane-padded) channels."""
    N, H, W, cin = x.shape
    planes = params['w1'].shape[0]
    cout_p = _round_up(planes, _LANE)
    has_proj = 'wsc' in params

    # conv1 (+ fused 1x1 projection conv) with BN partial stats
    raw1, scraw, stats1, (Ho, Wo, th) = _conv3x3_bn_stats(
        x, params['w1'], stride, cout_p,
        wsc_oihw=params['wsc'] if has_proj else None)
    count = N * Ho * Wo
    scale1, shift1 = _bn_scale_shift(stats1, 0, th * Wo, count,
                                     _pad_vec(params['g1'], cout_p),
                                     _pad_vec(params['b1'], cout_p))

    # conv2 with BN1-apply + ReLU fused into its input taps (h1 never hits HBM)
    raw2, _, stats2, (Ho2, Wo2, th2) = _conv3x3_bn_stats(
        raw1.reshape(N, Ho, Wo, cout_p), params['w2'], 1, cout_p,
        pre_scale=scale1, pre_shift=shift1)
    scale2, shift2 = _bn_scale_shift(stats2, 0, th2 * Wo2, count,
                                     _pad_vec(params['g2'], cout_p),
                                     _pad_vec(params['b2'], cout_p))

    # epilogue: bn2 + shortcut + ReLU in one gridded kernel
    if has_proj:
        scale_sc, shift_sc = _bn_scale_shift(stats1, 2, th * Wo, count,
                                             _pad_vec(params['gsc'], cout_p),
                                             _pad_vec(params['bsc'], cout_p))
        out = _bn_act_call(raw2, scale2, shift2, sc_mode="proj", relu=True,
                           out_dtype=jnp.bfloat16, th=th2, Wo=Wo2,
                           sc=scraw, sc_scale=scale_sc, sc_shift=shift_sc)
    else:
        sc_id = x.astype(jnp.bfloat16)
        if cin < cout_p:
            sc_id = jnp.pad(sc_id, ((0, 0), (0, 0), (0, 0), (0, cout_p - cin)))
        out = _bn_act_call(raw2, scale2, shift2, sc_mode="identity", relu=True,
                           out_dtype=jnp.bfloat16, th=th2, Wo=Wo2,
                           sc=sc_id.reshape(N, Ho * Wo, cout_p))

    return out.reshape(N, Ho, Wo, cout_p)


def _conv_bn_relu_nhwc(x, w, gamma, beta, stride=1):
    N = x.shape[0]
    planes = w.shape[0]
    cout_p = _round_up(planes, _LANE)
    raw, _, stats, (Ho, Wo, th) = _conv3x3_bn_stats(x, w, stride, cout_p)
    scale, shift = _bn_scale_shift(stats, 0, th * Wo, N * Ho * Wo,
                                   _pad_vec(gamma, cout_p), _pad_vec(beta, cout_p))
    y = _bn_act_call(raw, scale, shift, sc_mode="none", relu=True,
                     out_dtype=jnp.bfloat16, th=th, Wo=Wo)
    return y.reshape(N, Ho, Wo, cout_p)


def basic_block_forward(x_nchw, params, stride):
    """Pallas BasicBlock.forward; input/output NCHW (PyTorch layout)."""
    x = jnp.transpose(x_nchw, (0, 2, 3, 1)).astype(jnp.float32)
    planes = params['w1'].shape[0]
    out = _basic_block_nhwc(x, params, stride)[..., :planes].astype(jnp.float32)
    return jnp.transpose(out, (0, 3, 1, 2))


# ----------------------------------------------------------------------------
# CustomResNet head: Linear classifier + optional F.normalize
# ----------------------------------------------------------------------------
def _head_kernel(norm, x_ref, w_ref, b_ref, logits_ref, feat_ref):
    x = x_ref[...]                                              # (N, F) f32
    logits_ref[...] = (jnp.dot(x.astype(jnp.bfloat16), w_ref[...],
                               preferred_element_type=jnp.float32) + b_ref[...])
    if norm:
        nrm = jnp.sqrt(jnp.sum(x * x, axis=1, keepdims=True))
        feat_ref[...] = x / jnp.maximum(nrm, 1e-12)
    else:
        feat_ref[...] = x


def _head_call(feat, fc_w, fc_b, norm):
    N, F = feat.shape
    C = fc_w.shape[0]
    Cp = _round_up(C, _LANE)
    w = jnp.pad(jnp.transpose(fc_w.astype(jnp.float32)),
                ((0, 0), (0, Cp - C))).astype(jnp.bfloat16)     # (F, Cp)
    b = jnp.pad(fc_b.astype(jnp.float32), (0, Cp - C)).reshape(1, Cp)
    kernel = functools.partial(_head_kernel, norm)
    logits_p, feat_out = pl.pallas_call(
        kernel,
        out_shape=(jax.ShapeDtypeStruct((N, Cp), jnp.float32),
                   jax.ShapeDtypeStruct((N, F), jnp.float32)),
        in_specs=[pl.BlockSpec(memory_space=pltpu.MemorySpace.VMEM)] * 3,
        out_specs=(pl.BlockSpec(memory_space=pltpu.MemorySpace.VMEM),
                   pl.BlockSpec(memory_space=pltpu.MemorySpace.VMEM)),
        compiler_params=pltpu.CompilerParams(vmem_limit_bytes=_VMEM_LIMIT),
    )(feat.astype(jnp.float32), w, b)
    return logits_p[:, :C], feat_out


def custom_resnet_forward(x_nchw, params, norm=True, filter=None):
    """CustomResNet.forward: features -> flatten -> func -> classifier (-> normalize)."""
    x = jnp.transpose(x_nchw, (0, 2, 3, 1)).astype(jnp.float32)
    # self.features = stem + BasicBlocks + global average pool (resnet.children()[:-1])
    h = _conv_bn_relu_nhwc(x, params['stem']['w'], params['stem']['g'], params['stem']['b'])
    h = _basic_block_nhwc(h, params['block1'], stride=1)
    h = _basic_block_nhwc(h, params['block2'], stride=2)
    feat_dim = params['fc_w'].shape[1]
    feat = jnp.mean(h.astype(jnp.float32), axis=(1, 2))[:, :feat_dim]   # avgpool + flatten
    # TODO(synk): self.func(x, filter) is an arbitrary user-supplied callable; identity here.
    logits, feat_out = _head_call(feat, params['fc_w'], params['fc_b'], norm)
    return logits, feat_out


# ----------------------------------------------------------------------------
# Pure-JAX references (correctness checks)
# ----------------------------------------------------------------------------
def _ref_conv(h, w_oihw, stride, pad):
    return jax.lax.conv_general_dilated(
        h, jnp.transpose(w_oihw, (2, 3, 1, 0)), (stride, stride), pad,
        dimension_numbers=('NHWC', 'HWIO', 'NHWC'))


def _ref_bn(h, g, b):
    m = jnp.mean(h, axis=(0, 1, 2), keepdims=True)
    v = jnp.mean((h - m) ** 2, axis=(0, 1, 2), keepdims=True)
    return (h - m) * jax.lax.rsqrt(v + _EPS) * g.reshape(1, 1, 1, -1) + b.reshape(1, 1, 1, -1)


def _ref_block(h, p, stride):
    out = jax.nn.relu(_ref_bn(_ref_conv(h, p['w1'], stride, ((1, 1), (1, 1))), p['g1'], p['b1']))
    out = _ref_bn(_ref_conv(out, p['w2'], 1, ((1, 1), (1, 1))), p['g2'], p['b2'])
    if 'wsc' in p:
        sc = _ref_bn(_ref_conv(h, p['wsc'], stride, ((0, 0), (0, 0))), p['gsc'], p['bsc'])
    else:
        sc = h
    return jax.nn.relu(out + sc)


def basic_block_reference(x_nchw, params, stride):
    x = jnp.transpose(x_nchw, (0, 2, 3, 1)).astype(jnp.float32)
    return jnp.transpose(_ref_block(x, params, stride), (0, 3, 1, 2))


def custom_resnet_reference(x_nchw, p, norm=True):
    x = jnp.transpose(x_nchw, (0, 2, 3, 1)).astype(jnp.float32)
    h = jax.nn.relu(_ref_bn(_ref_conv(x, p['stem']['w'], 1, ((1, 1), (1, 1))),
                            p['stem']['g'], p['stem']['b']))
    h = _ref_block(h, p['block1'], 1)
    h = _ref_block(h, p['block2'], 2)
    feat = jnp.mean(h, axis=(1, 2))
    logits = feat @ p['fc_w'].T + p['fc_b']
    if norm:
        feat = feat / jnp.maximum(jnp.linalg.norm(feat, axis=1, keepdims=True), 1e-12)
    return logits, feat


# ----------------------------------------------------------------------------
# Deterministic parameter init
# ----------------------------------------------------------------------------
def init_params(key, in_planes, planes, stride):
    ks = jax.random.split(key, 9)
    fan1 = (in_planes * 9) ** -0.5
    fan2 = (planes * 9) ** -0.5
    p = {
        'w1': jax.random.normal(ks[0], (planes, in_planes, 3, 3), jnp.float32) * fan1,
        'g1': 1.0 + 0.1 * jax.random.normal(ks[1], (planes,), jnp.float32),
        'b1': 0.1 * jax.random.normal(ks[2], (planes,), jnp.float32),
        'w2': jax.random.normal(ks[3], (planes, planes, 3, 3), jnp.float32) * fan2,
        'g2': 1.0 + 0.1 * jax.random.normal(ks[4], (planes,), jnp.float32),
        'b2': 0.1 * jax.random.normal(ks[5], (planes,), jnp.float32),
    }
    if stride != 1 or in_planes != planes:   # expansion == 1
        p['wsc'] = jax.random.normal(ks[6], (planes, in_planes, 1, 1), jnp.float32) \
            * in_planes ** -0.5
        p['gsc'] = 1.0 + 0.1 * jax.random.normal(ks[7], (planes,), jnp.float32)
        p['bsc'] = 0.1 * jax.random.normal(ks[8], (planes,), jnp.float32)
    return p


def init_custom_resnet_params(key, in_ch, width, num_classes):
    ks = jax.random.split(key, 6)
    stem = {
        'w': jax.random.normal(ks[0], (width, in_ch, 3, 3), jnp.float32) * (in_ch * 9) ** -0.5,
        'g': 1.0 + 0.1 * jax.random.normal(ks[1], (width,), jnp.float32),
        'b': 0.1 * jax.random.normal(ks[2], (width,), jnp.float32),
    }
    block1 = init_params(ks[3], width, width, 1)
    block2 = init_params(ks[4], width, 2 * width, 2)
    kf1, kf2 = jax.random.split(ks[5])
    fc_w = jax.random.normal(kf1, (num_classes, 2 * width), jnp.float32) * (2 * width) ** -0.5
    fc_b = 0.1 * jax.random.normal(kf2, (num_classes,), jnp.float32)
    return {'stem': stem, 'block1': block1, 'block2': block2, 'fc_w': fc_w, 'fc_b': fc_b}


if __name__ == "__main__":
    key = jax.random.PRNGKey(0)
    kx, k1, k2, k3 = jax.random.split(key, 4)

    # PyTorch-style NCHW input (batch=2, channels=4, spatial=16).
    x = jax.random.normal(kx, (2, 4, 16, 16), jnp.float32)

    # Tolerances are bf16-MXU / bf16-intermediate vs f32 reference tolerances.
    TOL = dict(atol=5e-2, rtol=5e-2)

    # BasicBlock, config A: identity shortcut (stride=1, in_planes == planes)
    params_a = init_params(k1, in_planes=4, planes=4, stride=1)
    out_a = jax.block_until_ready(basic_block_forward(x, params_a, 1))
    ref_a = basic_block_reference(x, params_a, 1)
    assert out_a.shape == (2, 4, 16, 16)
    assert jnp.allclose(out_a, ref_a, **TOL), "basic block (identity) mismatch"

    # BasicBlock, config B: projection shortcut (stride=2, in_planes != planes)
    params_b = init_params(k2, in_planes=4, planes=8, stride=2)
    out_b = jax.block_until_ready(basic_block_forward(x, params_b, 2))
    ref_b = basic_block_reference(x, params_b, 2)
    assert out_b.shape == (2, 8, 8, 8)
    assert jnp.allclose(out_b, ref_b, **TOL), "basic block (projection) mismatch"

    # Full CustomResNet forward: features -> flatten -> func(identity) -> classifier, norm=True
    net = init_custom_resnet_params(k3, in_ch=4, width=8, num_classes=10)
    logits, feat = custom_resnet_forward(x, net, norm=True)
    jax.block_until_ready((logits, feat))
    ref_logits, ref_feat = custom_resnet_reference(x, net, norm=True)
    assert logits.shape == (2, 10) and feat.shape == (2, 16)
    assert jnp.allclose(logits, ref_logits, **TOL), "CustomResNet logits mismatch"
    assert jnp.allclose(feat, ref_feat, **TOL), "CustomResNet features mismatch"

    print("KERNEL_OK")
</pallas_src>

<mosaic_0001>
module attributes {stable_mosaic.version = 11 : i64} {
  func.func @_conv_stats_kernel(%arg0: i32, %arg1: i32, %arg2: memref<1x18x18x4xbf16, #tpu.memory_space<vmem>>, %arg3: memref<9x4x128xbf16, #tpu.memory_space<vmem>>, %arg4: memref<1x256x128xbf16, #tpu.memory_space<vmem>>, %arg5: memref<1x1x2x128xf32, #tpu.memory_space<vmem>>) attributes {dimension_semantics = [#tpu.dimension_semantics<parallel>, #tpu.dimension_semantics<parallel>], iteration_bounds = array<i64: 2, 1>, scalar_prefetch = 0 : i64, scratch_operands = 0 : i64, tpu.core_type = #tpu.core_type<tc>, window_params = [{transform_indices = @transform_0, window_bounds = array<i64: 1, 18, 18, 4>}, {pipeline_mode = #tpu.pipeline_mode<synchronous>, transform_indices = @transform_1, window_bounds = array<i64: 9, 4, 128>}, {transform_indices = @transform_2, window_bounds = array<i64: 1, 256, 128>}, {transform_indices = @transform_3, window_bounds = array<i64: 1, 1, 2, 128>}]} {
    %c16_i32 = arith.constant 16 : i32
    %0 = arith.muli %arg1, %c16_i32 : i32
    %c0 = arith.constant 0 : index
    %1 = arith.index_cast %0 : i32 to index
    %c0_0 = arith.constant 0 : index
    %c0_1 = arith.constant 0 : index
    %2 = vector.load %arg2[%c0, %1, %c0_0, %c0_1] : memref<1x18x18x4xbf16, #tpu.memory_space<vmem>>, vector<1x18x18x4xbf16>
    %3 = vector.shape_cast %2 : vector<1x18x18x4xbf16> to vector<18x18x4xbf16>
    %4 = vector.extract_strided_slice %3 {offsets = [0, 0, 0], sizes = [16, 16, 4], strides = [1, 1, 1]} : vector<18x18x4xbf16> to vector<16x16x4xbf16>
    %5 = vector.shape_cast %4 : vector<16x16x4xbf16> to vector<256x4xbf16>
    %6 = vector.extract_strided_slice %3 {offsets = [0, 1, 0], sizes = [16, 16, 4], strides = [1, 1, 1]} : vector<18x18x4xbf16> to vector<16x16x4xbf16>
    %7 = vector.shape_cast %6 : vector<16x16x4xbf16> to vector<256x4xbf16>
    %8 = vector.extract_strided_slice %3 {offsets = [0, 2, 0], sizes = [16, 16, 4], strides = [1, 1, 1]} : vector<18x18x4xbf16> to vector<16x16x4xbf16>
    %9 = vector.shape_cast %8 : vector<16x16x4xbf16> to vector<256x4xbf16>
    %10 = vector.extract_strided_slice %3 {offsets = [1, 0, 0], sizes = [16, 16, 4], strides = [1, 1, 1]} : vector<18x18x4xbf16> to vector<16x16x4xbf16>
    %11 = vector.shape_cast %10 : vector<16x16x4xbf16> to vector<256x4xbf16>
    %12 = vector.extract_strided_slice %3 {offsets = [1, 1, 0], sizes = [16, 16, 4], strides = [1, 1, 1]} : vector<18x18x4xbf16> to vector<16x16x4xbf16>
    %13 = vector.shape_cast %12 : vector<16x16x4xbf16> to vector<256x4xbf16>
    %14 = vector.extract_strided_slice %3 {offsets = [1, 2, 0], sizes = [16, 16, 4], strides = [1, 1, 1]} : vector<18x18x4xbf16> to vector<16x16x4xbf16>
    %15 = vector.shape_cast %14 : vector<16x16x4xbf16> to vector<256x4xbf16>
    %16 = vector.extract_strided_slice %3 {offsets = [2, 0, 0], sizes = [16, 16, 4], strides = [1, 1, 1]} : vector<18x18x4xbf16> to vector<16x16x4xbf16>
    %17 = vector.shape_cast %16 : vector<16x16x4xbf16> to vector<256x4xbf16>
    %18 = vector.extract_strided_slice %3 {offsets = [2, 1, 0], sizes = [16, 16, 4], strides = [1, 1, 1]} : vector<18x18x4xbf16> to vector<16x16x4xbf16>
    %19 = vector.shape_cast %18 : vector<16x16x4xbf16> to vector<256x4xbf16>
    %20 = vector.extract_strided_slice %3 {offsets = [2, 2, 0], sizes = [16, 16, 4], strides = [1, 1, 1]} : vector<18x18x4xbf16> to vector<16x16x4xbf16>
    %21 = vector.shape_cast %20 : vector<16x16x4xbf16> to vector<256x4xbf16>
    %cst = arith.constant 0.000000e+00 : f32
    %22 = vector.broadcast %cst : f32 to vector<256x128xf32>
    %c0_2 = arith.constant 0 : index
    %c0_3 = arith.constant 0 : index
    %c0_4 = arith.constant 0 : index
    %23 = vector.load %arg3[%c0_2, %c0_3, %c0_4] : memref<9x4x128xbf16, #tpu.memory_space<vmem>>, vector<1x4x128xbf16>
    %24 = vector.shape_cast %23 : vector<1x4x128xbf16> to vector<4x128xbf16>
    %cst_5 = arith.constant dense<0.000000e+00> : vector<256x128xf32>
    %25 = tpu.matmul %5, %24, %cst_5 {dimension_numbers = #tpu.dot_dimension_numbers<[1], [0], [0], [1], [0, 0, 1, 1], [], []>} : vector<256x4xbf16>, vector<4x128xbf16>, vector<256x128xf32> -> vector<256x128xf32>
    %26 = arith.addf %22, %25 : vector<256x128xf32>
    %c1 = arith.constant 1 : index
    %c0_6 = arith.constant 0 : index
    %c0_7 = arith.constant 0 : index
    %27 = vector.load %arg3[%c1, %c0_6, %c0_7] : memref<9x4x128xbf16, #tpu.memory_space<vmem>>, vector<1x4x128xbf16>
    %28 = vector.shape_cast %27 : vector<1x4x128xbf16> to vector<4x128xbf16>
    %cst_8 = arith.constant dense<0.000000e+00> : vector<256x128xf32>
    %29 = tpu.matmul %7, %28, %cst_8 {dimension_numbers = #tpu.dot_dimension_numbers<[1], [0], [0], [1], [0, 0, 1, 1], [], []>} : vector<256x4xbf16>, vector<4x128xbf16>, vector<256x128xf32> -> vector<256x128xf32>
    %30 = arith.addf %26, %29 : vector<256x128xf32>
    %c2 = arith.constant 2 : index
    %c0_9 = arith.constant 0 : index
    %c0_10 = arith.constant 0 : index
    %31 = vector.load %arg3[%c2, %c0_9, %c0_10] : memref<9x4x128xbf16, #tpu.memory_space<vmem>>, vector<1x4x128xbf16>
    %32 = vector.shape_cast %31 : vector<1x4x128xbf16> to vector<4x128xbf16>
    %cst_11 = arith.constant dense<0.000000e+00> : vector<256x128xf32>
    %33 = tpu.matmul %9, %32, %cst_11 {dimension_numbers = #tpu.dot_dimension_numbers<[1], [0], [0], [1], [0, 0, 1, 1], [], []>} : vector<256x4xbf16>, vector<4x128xbf16>, vector<256x128xf32> -> vector<256x128xf32>
    %34 = arith.addf %30, %33 : vector<256x128xf32>
    %c3 = arith.constant 3 : index
    %c0_12 = arith.constant 0 : index
    %c0_13 = arith.constant 0 : index
    %35 = vector.load %arg3[%c3, %c0_12, %c0_13] : memref<9x4x128xbf16, #tpu.memory_space<vmem>>, vector<1x4x128xbf16>
    %36 = vector.shape_cast %35 : vector<1x4x128xbf16> to vector<4x128xbf16>
    %cst_14 = arith.constant dense<0.000000e+00> : vector<256x128xf32>
    %37 = tpu.matmul %11, %36, %cst_14 {dimension_numbers = #tpu.dot_dimension_numbers<[1], [0], [0], [1], [0, 0, 1, 1], [], []>} : vector<256x4xbf16>, vector<4x128xbf16>, vector<256x128xf32> -> vector<256x128xf32>
    %38 = arith.addf %34, %37 : vector<256x128xf32>
    %c4 = arith.constant 4 : index
    %c0_15 = arith.constant 0 : index
    %c0_16 = arith.constant 0 : index
    %39 = vector.load %arg3[%c4, %c0_15, %c0_16] : memref<9x4x128xbf16, #tpu.memory_space<vmem>>, vector<1x4x128xbf16>
    %40 = vector.shape_cast %39 : vector<1x4x128xbf16> to vector<4x128xbf16>
    %cst_17 = arith.constant dense<0.000000e+00> : vector<256x128xf32>
    %41 = tpu.matmul %13, %40, %cst_17 {dimension_numbers = #tpu.dot_dimension_numbers<[1], [0], [0], [1], [0, 0, 1, 1], [], []>} : vector<256x4xbf16>, vector<4x128xbf16>, vector<256x128xf32> -> vector<256x128xf32>
    %42 = arith.addf %38, %41 : vector<256x128xf32>
    %c5 = arith.constant 5 : index
    %c0_18 = arith.constant 0 : index
    %c0_19 = arith.constant 0 : index
    %43 = vector.load %arg3[%c5, %c0_18, %c0_19] : memref<9x4x128xbf16, #tpu.memory_space<vmem>>, vector<1x4x128xbf16>
    %44 = vector.shape_cast %43 : vector<1x4x128xbf16> to vector<4x128xbf16>
    %cst_20 = arith.constant dense<0.000000e+00> : vector<256x128xf32>
    %45 = tpu.matmul %15, %44, %cst_20 {dimension_numbers = #tpu.dot_dimension_numbers<[1], [0], [0], [1], [0, 0, 1, 1], [], []>} : vector<256x4xbf16>, vector<4x128xbf16>, vector<256x128xf32> -> vector<256x128xf32>
    %46 = arith.addf %42, %45 : vector<256x128xf32>
    %c6 = arith.constant 6 : index
    %c0_21 = arith.constant 0 : index
    %c0_22 = arith.constant 0 : index
    %47 = vector.load %arg3[%c6, %c0_21, %c0_22] : memref<9x4x128xbf16, #tpu.memory_space<vmem>>, vector<1x4x128xbf16>
    %48 = vector.shape_cast %47 : vector<1x4x128xbf16> to vector<4x128xbf16>
    %cst_23 = arith.constant dense<0.000000e+00> : vector<256x128xf32>
    %49 = tpu.matmul %17, %48, %cst_23 {dimension_numbers = #tpu.dot_dimension_numbers<[1], [0], [0], [1], [0, 0, 1, 1], [], []>} : vector<256x4xbf16>, vector<4x128xbf16>, vector<256x128xf32> -> vector<256x128xf32>
    %50 = arith.addf %46, %49 : vector<256x128xf32>
    %c7 = arith.constant 7 : index
    %c0_24 = arith.constant 0 : index
    %c0_25 = arith.constant 0 : index
    %51 = vector.load %arg3[%c7, %c0_24, %c0_25] : memref<9x4x128xbf16, #tpu.memory_space<vmem>>, vector<1x4x128xbf16>
    %52 = vector.shape_cast %51 : vector<1x4x128xbf16> to vector<4x128xbf16>
    %cst_26 = arith.constant dense<0.000000e+00> : vector<256x128xf32>
    %53 = tpu.matmul %19, %52, %cst_26 {dimension_numbers = #tpu.dot_dimension_numbers<[1], [0], [0], [1], [0, 0, 1, 1], [], []>} : vector<256x4xbf16>, vector<4x128xbf16>, vector<256x128xf32> -> vector<256x128xf32>
    %54 = arith.addf %50, %53 : vector<256x128xf32>
    %c8 = arith.constant 8 : index
    %c0_27 = arith.constant 0 : index
    %c0_28 = arith.constant 0 : index
    %55 = vector.load %arg3[%c8, %c0_27, %c0_28] : memref<9x4x128xbf16, #tpu.memory_space<vmem>>, vector<1x4x128xbf16>
    %56 = vector.shape_cast %55 : vector<1x4x128xbf16> to vector<4x128xbf16>
    %cst_29 = arith.constant dense<0.000000e+00> : vector<256x128xf32>
    %57 = tpu.matmul %21, %56, %cst_29 {dimension_numbers = #tpu.dot_dimension_numbers<[1], [0], [0], [1], [0, 0, 1, 1], [], []>} : vector<256x4xbf16>, vector<4x128xbf16>, vector<256x128xf32> -> vector<256x128xf32>
    %58 = arith.addf %54, %57 : vector<256x128xf32>
    %59 = arith.truncf %58 : vector<256x128xf32> to vector<256x128xbf16>
    %c0_30 = arith.constant 0 : index
    %c0_31 = arith.constant 0 : index
    %c0_32 = arith.constant 0 : index
    %60 = vector.load %arg4[%c0_30, %c0_31, %c0_32] : memref<1x256x128xbf16, #tpu.memory_space<vmem>>, vector<1x256x128xbf16>
    %61 = vector.shape_cast %60 : vector<1x256x128xbf16> to vector<256x128xbf16>
    %62 = vector.shape_cast %59 : vector<256x128xbf16> to vector<1x256x128xbf16>
    tpu.vector_store %arg4[%c0_30, %c0_31, %c0_32], %62 {strides = array<i32>} : memref<1x256x128xbf16, #tpu.memory_space<vmem>>, vector<1x256x128xbf16>,
    %cst_33 = arith.constant dense<0.000000e+00> : vector<128xf32>
    %63 = vector.multi_reduction <add>, %58, %cst_33 [0] : vector<256x128xf32> to vector<128xf32>
    %64 = vector.shape_cast %63 : vector<128xf32> to vector<1x128xf32>
    %cst_34 = arith.constant 3.906250e-03 : f32
    %65 = vector.broadcast %cst_34 : f32 to vector<1x128xf32>
    %66 = arith.mulf %64, %65 : vector<1x128xf32>
    %67 = vector.broadcast %66 : vector<1x128xf32> to vector<256x128xf32>
    %68 = arith.subf %58, %67 : vector<256x128xf32>
    %69 = arith.mulf %68, %68 : vector<256x128xf32>
    %cst_35 = arith.constant dense<0.000000e+00> : vector<128xf32>
    %70 = vector.multi_reduction <add>, %69, %cst_35 [0] : vector<256x128xf32> to vector<128xf32>
    %71 = vector.shape_cast %70 : vector<128xf32> to vector<1x128xf32>
    %72 = tpu.concatenate %64, %71 in 0 : vector<1x128xf32>, vector<1x128xf32> -> vector<2x128xf32>
    %c0_36 = arith.constant 0 : index
    %c0_37 = arith.constant 0 : index
    %c0_38 = arith.constant 0 : index
    %c0_39 = arith.constant 0 : index
    %73 = vector.load %arg5[%c0_36, %c0_37, %c0_38, %c0_39] : memref<1x1x2x128xf32, #tpu.memory_space<vmem>>, vector<1x1x2x128xf32>
    %74 = vector.shape_cast %73 : vector<1x1x2x128xf32> to vector<2x128xf32>
    %75 = vector.shape_cast %72 : vector<2x128xf32> to vector<1x1x2x128xf32>
    tpu.vector_store %arg5[%c0_36, %c0_37, %c0_38, %c0_39], %75 {strides = array<i32>} : memref<1x1x2x128xf32, #tpu.memory_space<vmem>>, vector<1x1x2x128xf32>,
    return
  }
  func.func @transform_0(%arg0: i32, %arg1: i32) -> (i32, i32, i32, i32) {
    %c0_i32 = arith.constant 0 : i32
    %c0_i32_0 = arith.constant 0 : i32
    %c0_i32_1 = arith.constant 0 : i32
    %c0_i32_2 = arith.constant 0 : i32
    return %arg0, %c0_i32, %c0_i32_0, %c0_i32_1 : i32, i32, i32, i32
  }
  func.func @transform_1(%arg0: i32, %arg1: i32) -> (i32, i32, i32) {
    %c0_i32 = arith.constant 0 : i32
    %c0_i32_0 = arith.constant 0 : i32
    %c0_i32_1 = arith.constant 0 : i32
    %c0_i32_2 = arith.constant 0 : i32
    return %c0_i32, %c0_i32_0, %c0_i32_1 : i32, i32, i32
  }
  func.func @transform_2(%arg0: i32, %arg1: i32) -> (i32, i32, i32) {
    %c0_i32 = arith.constant 0 : i32
    %c0_i32_0 = arith.constant 0 : i32
    return %arg0, %arg1, %c0_i32 : i32, i32, i32
  }
  func.func @transform_3(%arg0: i32, %arg1: i32) -> (i32, i32, i32, i32) {
    %c0_i32 = arith.constant 0 : i32
    %c0_i32_0 = arith.constant 0 : i32
    %c0_i32_1 = arith.constant 0 : i32
    return %arg0, %arg1, %c0_i32, %c0_i32_0 : i32, i32, i32, i32
  }
}

</mosaic_0001>

<bundles_post_ra>
// kernel: tpu_custom_call.1
= control target key start
LH: loop header
LB: loop body
LE: loop exit
PB: predicated region body
PF: predicated region fallthrough
CT: control target
= control target key end

     0   :  { %9 = vsyncpa [#allocation3], 0  ;;  %s4580_s0 = inlined_call_operand.vmem [shape: bf16[2,18,18,4], index: 0, kind: input, shape index: {}]   ;;  %s4581_s1 = inlined_call_operand.vmem [shape: bf16[9,4,128], index: 1, kind: input, shape index: {}]   ;;  %s4582_s2 = inlined_call_operand.hbm [shape: bf16[2,256,128], index: 2, kind: output, shape index: {0}]   ;;  %s4583_s3 = inlined_call_operand.hbm [shape: f32[2,1,2,128], index: 3, kind: output, shape index: {1}]  }
   0x1   :  { %11 = vsyncpa [#allocation3 + $0x1], 0 }
   0x2   :  { %12 = vsyncpa [#allocation5], 0 }
   0x3   :  { %14 = vsyncpa [#allocation5 + $0x1], 0  ;;  %s3201_s12 = smov 0   ;;  %s3203_s13 = smov 0  }
   0x4   :  { %s3205_s14 = smov 0   ;;  %s3207_s15 = smov 0  }
   0x5   :  { %s3209_s16 = smov 0   ;;  %s3211_s17 = smov 0  }
   0x6 LB: > { %s2622_s18 = sadd.s32 4294967295, %s3177_s17   ;;  %s2623_s19 = sadd.s32 4294967294, %s3177_s17   ;;  %s3177_s17 = sphi %s3211_s17, %s20_s17   ;;  %s3173_s16 = sphi %s3209_s16, %s4729_s16   ;;  %s3169_s15 = sphi %s3207_s15, %s4728_s15   ;;  %s3165_s14 = sphi %s3205_s14, %s4727_s14   ;;  %s3161_s13 = sphi %s3203_s13, %s4726_s13   ;;  %s3157_s12 = sphi %s3201_s12, %s4725_s12  }
   0x7   : > { %s32_s20 = sadd.s32 1, %s3173_s16  ;;  %s88_s21 = sadd.s32 1, %s3165_s14 }
   0x8   : > { %p34_p0 = scmp.ge.s32.totalorder %s32_s20, 2  ;;  %p98_p1 = scmp.ne.s32.totalorder %s3165_s14, %s3161_s13 }
   0x9   : > { %p99_p2 = scmp.eq.s32.totalorder %s2622_s18, 1  ;;  %p104_p3 = scmp.ne.s32.totalorder %s3161_s13, %s3157_s12 }
   0xa   : > { %s4731_s20 = smov (%p34_p0, %s32_s20), 0  ;;  %p105_p5 = scmp.eq.s32.totalorder %s2623_s19, 1 }
   0xb   : > { %p3241_p4 = por %p99_p2, %p98_p1  ;;  %s83_s23 = ssub.s32 %s3173_s16, %s4731_s20 }
   0xc   : > { %p2626_p6 = scmp.ge.s32.totalorder %s3177_s17, 1  ;;  %p86_p7 = scmp.eq.s32.totalorder %s83_s23, 0 }
   0xd   : > { %p3248_p8 = por %p105_p5, %p104_p3  ;;  %p162_p9 = scmp.lt.s32.totalorder %s3177_s17, 3 }
   0xe   : > { %s3254_s25 = scalar_select %p86_p7, %s3165_s14, %s88_s21  }
   0xf   : > { %p163_p10 = pnand %p2626_p6, %p162_p9 }
  0x11   : > { %166 = sbr.rel (%p163_p10) target bundleno = 863 (0x35f), region = 28 }
  0x16   : > { %v2648_v0 = vld [vmem:[%s4581_s1 + $0x2] sm:$0x3]  ;;  %vm974_vm0 = vcmask 1041408   ;;  %p191_p11 = scmp.lt.s32.totalorder %s3169_s15, 1  ;;  %v2745_v2 = vld [vmem:[%s4581_s1 + $0x4] sm:$0x3] }
  0x17   : > { %v976_v1 = vsel %vm974_vm0, %v2648_v0, 0  ;;  %v1354_v3 = vsel %vm974_vm0, %v2745_v2, 0  ;;  %v2762_v4 = vld [vmem:[%s4581_s1 + $0x6] sm:$0x3]  ;;  %v874_v5 = vld [vmem:[%s4581_s1] sm:$0x3] }
  0x18   : > { %2993 = vmatpush.bf16.msra.mxu1 %v976_v1  ;;  %2994 = vmatpush.bf16.msra.mxu2 %v976_v1  ;;  %s192_s30 = scalar_select %p191_p11, %s3169_s15, 1  ;;  %v2783_v6 = vld [vmem:[%s4581_s1 + $0x8] sm:$0x3]  ;;  %v1486_v7 = vsel %vm974_vm0, %v2762_v4, 0  ;;  %v1164_v8 = vsel %vm974_vm0, %v874_v5, 0  ;;  %vm925_vm4 = vcmask 31744  }
  0x19   : > { %2995 = vmatpush.bf16.msra.mxu3 %v976_v1  ;;  %985 = vmatpush.bf16.msra.mxu0 %v976_v1  ;;  %v1618_v9 = vsel %vm974_vm0, %v2783_v6, 0  ;;  %vm256_vm1 = vsmask.f32 3328  ;;  %vm257_vm2 = vsmask.f32 7440  ;;  %vm691_vm5 = vcmask 1042432  }
  0x1a   : > { %s2996_s10 = smul.u32 216, %s192_s30  ;;  %vm3308_vm3 = vmor %vm256_vm1, %vm257_vm2  ;;  %vm692_vm6 = vcmask 1046532   ;;  %s4199_s5 = sand.u32 1, %s3161_s13  }
  0x1b   : > { %vm3611_vm7 = vmor %vm691_vm5, %vm692_vm6  ;;  %s2627_s6 = sshll.u32 %s4199_s5, 7  ;;  %s2897_s8 = sshll.u32 %s3169_s15, 7 }
  0x1c   : > { %1363 = vmatpush.bf16.msrb.mxu2 %v1354_v3  ;;  %1173 = vmatpush.bf16.msrb.mxu1 %v1164_v8  ;;  %s3281_s19 = scalar_lea.vmem %s4580_s0, %s2996_s10  ;;  %s4212_s7 = scalar_lea.vmem [#allocation2], %s2627_s6 }
  0x1d   : > { %1495 = vmatpush.bf16.msrb.mxu3 %v1486_v7  ;;  %1627 = vmatpush.bf16.msrb.mxu0 %v1618_v9  ;;  %v3284_v10 = vld [vmem:[%s3281_s19 + $0x30] sm:$0xf]  ;;  %v3287_v11 = vld [vmem:[%s3281_s19 + $0x34] sm:$0xf]  ;;  %v3290_v12 = vld [vmem:[%s3281_s19 + $0x38] sm:$0x1]  ;;  %s2494_s11 = scalar_lea.hbm %s4582_s2, %s2897_s8 }
  0x1e   : > { %v356_v13 = vshrl.u32 %v3284_v10, 16  ;;  %v359_v14 = vshll.u32 %v3284_v10, 16  ;;  %v365_v15 = vshll.u32 %v3287_v11, 16  ;;  %v369_v16 = vshrl.u32 %v3287_v11, 16  ;;  %v226_v17 = vld [vmem:[%s3281_s19 + $0x60] sm:$0xf] }
  0x1f   : > { %v375_v18 = vshll.u32 %v3290_v12, 16  ;;  %v3299_v19 = vld [vmem:[%s3281_s19 + $0x64] sm:$0xf]  ;;  %v228_v20 = vld [vmem:[%s3281_s19 + $0x68] sm:$0x1]  ;;  %v452_v21 = vshrl.u32 %v226_v17, 16 }
  0x20   : > { %v358_v22 = vrot.slane %v356_v13, 4  ;;  %v361_v23 = vrot.slane %v359_v14, 5  ;;  %v367_v24 = vrot.slane %v365_v15, 5  ;;  %v371_v25 = vrot.slane %v369_v16, 4  ;;  %v238_v26 = vld [vmem:[%s3281_s19 + $0x90] sm:$0xf] }
  0x21   : > { %v377_v27 = vrot.slane %v375_v18, 5  ;;  %v454_v28 = vrot.slane %v452_v21, 4  ;;  %v455_v29 = vshll.u32 %v226_v17, 16  ;;  %v461_v30 = vshll.u32 %v3299_v19, 16  ;;  %v239_v35 = vld [vmem:[%s3281_s19 + $0x94] sm:$0xf] }
  0x22   : > { %v362_v31 = vor.u32 %v361_v23, %v358_v22  ;;  %v372_v32 = vor.u32 %v371_v25, %v367_v24  ;;  %v465_v33 = vshrl.u32 %v3299_v19, 16  ;;  %v471_v34 = vshll.u32 %v228_v20, 16  ;;  %v240_v45 = vld [vmem:[%s3281_s19 + $0x98] sm:$0x1]  ;;  %v3318_v61 = vld [vmem:[%s3281_s19] sm:$0xf] }
  0x23   : > { %v457_v37 = vrot.slane %v455_v29, 5  ;;  %v463_v38 = vrot.slane %v461_v30, 5  ;;  %v548_v39 = vshrl.u32 %v238_v26, 16  ;;  %v551_v47 = vshll.u32 %v238_v26, 16  ;;  %v3325_v1 = vld [vmem:[%s3281_s19 + $0x4] sm:$0xf] }
  0x24   : > { %v363_v40 = vrot.slane %v362_v31, 4  ;;  %v373_v41 = vrot.slane %v372_v32, 4  ;;  %v467_v42 = vrot.slane %v465_v33, 4  ;;  %v473_v43 = vrot.slane %v471_v34, 5  ;;  %v3328_v2 = vld [vmem:[%s3281_s19 + $0x8] sm:$0x1] }
  0x25   : > { %v458_v44 = vor.u32 %v457_v37, %v454_v28  ;;  %v550_v46 = vrot.slane %v548_v39, 4  ;;  %v557_v48 = vshll.u32 %v239_v35, 16  ;;  %v561_v52 = vshrl.u32 %v239_v35, 16  ;;  %v3344_v23 = vld [vmem:[%s3281_s19 + $0x3c] sm:$0xf]  ;;  %s2495_s18 = sshll.u32 %s4212_s7, 4  ;;  %s2496_s18 = int_to_ptr.vmem [resolvable:$true] %s2495_s18 }
  0x26   : > { %v368_v49 = vsel %vm3308_vm3, %v363_v40, %v367_v24  ;;  %v378_v50 = vsel %vm3308_vm3, %v373_v41, %v377_v27  ;;  %v468_v51 = vor.u32 %v467_v42, %v463_v38  ;;  %v553_v56 = vrot.slane %v551_v47, 5  ;;  %v3347_v24 = vld [vmem:[%s3281_s19 + $0x40] sm:$0xf]  ;;  %v3352_v29 = vld [vmem:[%s3281_s19 + $0x44] sm:$0x1]  ;;  %s2476_s21 = scalar_lea.sflag [#allocation3], %s4199_s5 }
  0x27   : > { %v885_v53 = vunpack.c.l.b16 %v368_v49  ;;  %v886_v54 = vunpack.c.l.b16 %v378_v50  ;;  %v459_v55 = vrot.slane %v458_v44, 4  ;;  %v559_v58 = vrot.slane %v557_v48, 5  ;;  %v3367_v47 = vld [vmem:[%s3281_s19 + $0x70] sm:$0xf]  ;;  %s3087_s29 = scalar_lea.hbm %s4582_s2, 256 }
  0x28   : > { %v469_v57 = vrot.slane %v468_v51, 4  ;;  %v563_v59 = vrot.slane %v561_v52, 4  ;;  %v567_v60 = vshll.u32 %v240_v45, 16  ;;  %v554_v0 = vor.u32 %v553_v56, %v550_v46  ;;  %v3374_v51 = vld [vmem:[%s3281_s19 + $0x74] sm:$0x1] }
  0x29   : > { %v3320_v62 = vpack.c.b16 %v886_v54, %v885_v53  ;;  %v464_v63 = vsel %vm3308_vm3, %v459_v55, %v463_v38  ;;  %v260_v9 = vshrl.u32 %v3318_v61, 16  ;;  %v263_v13 = vshll.u32 %v3318_v61, 16  ;;  %v3360_v38 = vld [vmem:[%s3281_s19 + $0x6c] sm:$0xf] }
  0x2a   : > { %v474_v3 = vsel %vm3308_vm3, %v469_v57, %v473_v43  ;;  %v893_v4 = vunpack.c.l.b16 %v464_v63  ;;  %v564_v5 = vor.u32 %v563_v59, %v559_v58  ;;  %v569_v6 = vrot.slane %v567_v60, 5 }
  0x2b   : > { %2653 = vmatmul.msk.bf16.vlgmr.msra.gmra.mxu1 %vm925_vm4, %v3320_v62  ;;  %v894_v7 = vunpack.c.l.b16 %v474_v3  ;;  %v555_v8 = vrot.slane %v554_v0, 4  ;;  %v269_v15 = vshll.u32 %v3325_v1, 16  ;;  %v273_v16 = vshrl.u32 %v3325_v1, 16 }
  0x2c   : > { %v565_v14 = vrot.slane %v564_v5, 4  ;;  %v279_v17 = vshll.u32 %v3328_v2, 16  ;;  %v262_v21 = vrot.slane %v260_v9, 4  ;;  %v265_v22 = vrot.slane %v263_v13, 5  ;;  %v241_v5 = vld [vmem:[%s3281_s19 + $0x9c] sm:$0xf] }
  0x2d   : > { %v3339_v18 = vpack.c.b16 %v894_v7, %v893_v4  ;;  %v560_v20 = vsel %vm3308_vm3, %v555_v8, %v559_v58  ;;  %v271_v27 = vrot.slane %v269_v15, 5  ;;  %v275_v28 = vrot.slane %v273_v16, 4  ;;  %v242_v9 = vld [vmem:[%s3281_s19 + $0xa0] sm:$0xf] }
  0x2e   : > { %v570_v25 = vsel %vm3308_vm3, %v565_v14, %v569_v6  ;;  %v901_v26 = vunpack.c.l.b16 %v560_v20  ;;  %v266_v31 = vor.u32 %v265_v22, %v262_v21  ;;  %v281_v32 = vrot.slane %v279_v17, 5  ;;  %v243_v17 = vld [vmem:[%s3281_s19 + $0xa4] sm:$0x1] }
  0x2f   : > { %4628 = vst [vmem:[#allocation8_spill] sm:$0xff] %v3339_v18  ;;  %2657 = vmatmul.msk.bf16.vlgmr.msra.gmra.mxu2 %vm925_vm4, %v3339_v18  ;;  %v902_v30 = vunpack.c.l.b16 %v570_v25  ;;  %v276_v33 = vor.u32 %v275_v28, %v271_v27  ;;  %v380_v34 = vshrl.u32 %v3344_v23, 16  ;;  %v383_v35 = vshll.u32 %v3344_v23, 16 }
  0x30   : > { %v389_v37 = vshll.u32 %v3347_v24, 16  ;;  %v267_v40 = vrot.slane %v266_v31, 4  ;;  %v393_v41 = vshrl.u32 %v3347_v24, 16  ;;  %v399_v42 = vshll.u32 %v3352_v29, 16 }
  0x31   : > { %v3362_v39 = vpack.c.b16 %v902_v30, %v901_v26  ;;  %v277_v43 = vrot.slane %v276_v33, 4  ;;  %v382_v44 = vrot.slane %v380_v34, 4  ;;  %v385_v45 = vrot.slane %v383_v35, 5  ;;  %v3392_v35 = vld [vmem:[%s3281_s19 + $0xc] sm:$0xf] }
  0x32   : > { %v391_v46 = vrot.slane %v389_v37, 5  ;;  %v272_v48 = vsel %vm3308_vm3, %v267_v40, %v271_v27  ;;  %v395_v49 = vrot.slane %v393_v41, 4  ;;  %v401_v50 = vrot.slane %v399_v42, 5 }
  0x33   : > { %4629 = vst [vmem:[#allocation9_spill] sm:$0xff] %v3362_v39  ;;  %2661 = vmatmul.msk.bf16.vlgmr.msra.gmra.mxu3 %vm925_vm4, %v3362_v39  ;;  %v476_v52 = vshrl.u32 %v3360_v38, 16  ;;  %v282_v53 = vsel %vm3308_vm3, %v277_v43, %v281_v32  ;;  %v877_v54 = vunpack.c.l.b16 %v272_v48  ;;  %v386_v55 = vor.u32 %v385_v45, %v382_v44  ;;  %v3399_v43 = vld [vmem:[%s3281_s19 + $0x10] sm:$0xf]  ;;  %v3402_v48 = vld [vmem:[%s3281_s19 + $0x14] sm:$0x1] }
  0x34   : > { %v479_v56 = vshll.u32 %v3360_v38, 16  ;;  %v878_v57 = vunpack.c.l.b16 %v282_v53  ;;  %v396_v58 = vor.u32 %v395_v49, %v391_v46  ;;  %v485_v60 = vshll.u32 %v3367_v47, 16  ;;  %v3579_v39 = vld [vmem:[%s3281_s19 + $0x2c] sm:$0x1] }
  0x35   : > { %v478_v59 = vrot.slane %v476_v52, 4  ;;  %v387_v63 = vrot.slane %v386_v55, 4  ;;  %v489_v3 = vshrl.u32 %v3367_v47, 16  ;;  %v495_v4 = vshll.u32 %v3374_v51, 16 }
  0x36   : > { %v481_v0 = vrot.slane %v479_v56, 5  ;;  %v909_v6 = vpack.c.b16 %v878_v57, %v877_v54  ;;  %v397_v7 = vrot.slane %v396_v58, 4  ;;  %v487_v8 = vrot.slane %v485_v60, 5  ;;  %v3412_v58 = vld [vmem:[%s3281_s19 + $0x48] sm:$0xf] }
  0x37   : > { %v392_v13 = vsel %vm3308_vm3, %v387_v63, %v391_v46  ;;  %v491_v15 = vrot.slane %v489_v3, 4  ;;  %v497_v16 = vrot.slane %v495_v4, 5  ;;  %v572_v22 = vshrl.u32 %v241_v5, 16  ;;  %v3417_v3 = vld [vmem:[%s3281_s19 + $0x4c] sm:$0xf] }
  0x38   : > { %v482_v14 = vor.u32 %v481_v0, %v478_v59  ;;  %2649 = vmatmul.msk.bf16.vlgmr.msra.gmra.mxu0 %vm925_vm4, %v909_v6  ;;  %v402_v20 = vsel %vm3308_vm3, %v397_v7, %v401_v50  ;;  %v887_v21 = vunpack.c.l.b16 %v392_v13  ;;  %v575_v25 = vshll.u32 %v241_v5, 16 }
  0x39   : > { %v888_v26 = vunpack.c.l.b16 %v402_v20  ;;  %v492_v28 = vor.u32 %v491_v15, %v487_v8  ;;  %v581_v30 = vshll.u32 %v242_v9, 16  ;;  %v574_v31 = vrot.slane %v572_v22, 4  ;;  %v3424_v15 = vld [vmem:[%s3281_s19 + $0x50] sm:$0x1] }
  0x3a   : > { %v483_v27 = vrot.slane %v482_v14, 4  ;;  %v577_v32 = vrot.slane %v575_v25, 5  ;;  %v585_v33 = vshrl.u32 %v242_v9, 16  ;;  %v591_v34 = vshll.u32 %v243_v17, 16 }
  0x3b   : > { %v3394_v37 = vpack.c.b16 %v888_v26, %v887_v21  ;;  %v493_v41 = vrot.slane %v492_v28, 4  ;;  %v583_v42 = vrot.slane %v581_v30, 5  ;;  %v284_v52 = vshrl.u32 %v3392_v35, 16  ;;  %v3435_v28 = vld [vmem:[%s3281_s19 + $0x78] sm:$0xf] }
  0x3c   : > { %v488_v40 = vsel %vm3308_vm3, %v483_v27, %v487_v8  ;;  %v578_v45 = vor.u32 %v577_v32, %v574_v31  ;;  %v587_v46 = vrot.slane %v585_v33, 4  ;;  %v593_v50 = vrot.slane %v591_v34, 5  ;;  %v3439_v34 = vld [vmem:[%s3281_s19 + $0x7c] sm:$0xf] }
  0x3d   : > { %v895_v44 = vunpack.c.l.b16 %v488_v40  ;;  %2654 = vmatmul.msk.bf16.gmra.mxu1 %vm925_vm4, %v3394_v37  ;;  %v498_v49 = vsel %vm3308_vm3, %v493_v41, %v497_v16  ;;  %v287_v53 = vshll.u32 %v3392_v35, 16  ;;  %v293_v57 = vshll.u32 %v3399_v43, 16 }
  0x3e   : > { %v896_v54 = vunpack.c.l.b16 %v498_v49  ;;  %v579_v55 = vrot.slane %v578_v45, 4  ;;  %v588_v56 = vor.u32 %v587_v46, %v583_v42  ;;  %v286_v59 = vrot.slane %v284_v52, 4 }
  0x3f   : > { %v289_v60 = vrot.slane %v287_v53, 5  ;;  %v297_v63 = vshrl.u32 %v3399_v43, 16  ;;  %v303_v0 = vshll.u32 %v3402_v48, 16  ;;  %v295_v7 = vrot.slane %v293_v57, 5 }
  0x40   : > { %v3419_v4 = vpack.c.b16 %v896_v54, %v895_v44  ;;  %v584_v5 = vsel %vm3308_vm3, %v579_v55, %v583_v42  ;;  %v589_v6 = vrot.slane %v588_v56, 4  ;;  %v404_v17 = vshrl.u32 %v3412_v58, 16 }
  0x41   : > { %v903_v8 = vunpack.c.l.b16 %v584_v5  ;;  %v290_v9 = vor.u32 %v289_v60, %v286_v59  ;;  %v299_v13 = vrot.slane %v297_v63, 4  ;;  %v305_v14 = vrot.slane %v303_v0, 5 }
  0x42   : > { %2658 = vmatmul.msk.bf16.gmra.mxu2 %vm925_vm4, %v3419_v4  ;;  %v594_v16 = vsel %vm3308_vm3, %v589_v6, %v593_v50  ;;  %v407_v20 = vshll.u32 %v3412_v58, 16  ;;  %v413_v21 = vshll.u32 %v3417_v3, 16  ;;  %v417_v27 = vshrl.u32 %v3417_v3, 16  ;;  %v3446_v50 = vld [vmem:[%s3281_s19 + $0x80] sm:$0x1] }
  0x43   : > { %v904_v22 = vunpack.c.l.b16 %v594_v16  ;;  %v291_v25 = vrot.slane %v290_v9, 4  ;;  %v300_v26 = vor.u32 %v299_v13, %v295_v7  ;;  %v406_v30 = vrot.slane %v404_v17, 4  ;;  %v3465_v16 = vld [vmem:[%s3281_s19 + $0xac] sm:$0xf]  ;;  %v3468_v17 = vld [vmem:[%s3281_s19 + $0xb0] sm:$0x1] }
  0x44   : > { %v409_v31 = vrot.slane %v407_v20, 5  ;;  %v415_v32 = vrot.slane %v413_v21, 5  ;;  %v423_v33 = vshll.u32 %v3424_v15, 16  ;;  %v419_v44 = vrot.slane %v417_v27, 4  ;;  %4632 = vst [vmem:[#allocation12_spill] sm:$0xff] %v3465_v16 }
  0x45   : > { %v3441_v40 = vpack.c.b16 %v904_v22, %v903_v8  ;;  %v296_v41 = vsel %vm3308_vm3, %v291_v25, %v295_v7  ;;  %v301_v42 = vrot.slane %v300_v26, 4  ;;  %v500_v52 = vshrl.u32 %v3435_v28, 16  ;;  %v3458_v8 = vld [vmem:[%s3281_s19 + $0xa8] sm:$0xf]  ;;  %4633 = vst [vmem:[#allocation13_spill] sm:$0xff] %v3468_v17 }
  0x46   : > { %v879_v45 = vunpack.c.l.b16 %v296_v41  ;;  %v410_v46 = vor.u32 %v409_v31, %v406_v30  ;;  %v425_v49 = vrot.slane %v423_v33, 5  ;;  %v420_v54 = vor.u32 %v419_v44, %v415_v32  ;;  %4631 = vst [vmem:[#allocation11_spill] sm:$0xff] %v3458_v8 }
  0x47   : > { %4630 = vst [vmem:[#allocation10_spill] sm:$0xff] %v3441_v40  ;;  %2662 = vmatmul.msk.bf16.gmra.mxu3 %vm925_vm4, %v3441_v40  ;;  %v306_v53 = vsel %vm3308_vm3, %v301_v42, %v305_v14  ;;  %v503_v55 = vshll.u32 %v3435_v28, 16  ;;  %v509_v56 = vshll.u32 %v3439_v34, 16  ;;  %v502_v60 = vrot.slane %v500_v52, 4  ;;  %v3482_v52 = vld [vmem:[%s3281_s19 + $0x18] sm:$0xf] }
  0x48   : > { %v880_v57 = vunpack.c.l.b16 %v306_v53  ;;  %v411_v59 = vrot.slane %v410_v46, 4  ;;  %v513_v63 = vshrl.u32 %v3439_v34, 16  ;;  %v421_v0 = vrot.slane %v420_v54, 4  ;;  %v3568_v40 = vld [vmem:[%s3281_s19 + $0x24] sm:$0xf] }
  0x49   : > { %v505_v5 = vrot.slane %v503_v55, 5  ;;  %v511_v6 = vrot.slane %v509_v56, 5  ;;  %v519_v7 = vshll.u32 %v3446_v50, 16  ;;  %v596_v30 = vshrl.u32 %v3458_v8, 16  ;;  %v3487_v56 = vld [vmem:[%s3281_s19 + $0x1c] sm:$0xf] }
  0x4a   : > { %v3460_v9 = vpack.c.b16 %v880_v57, %v879_v45  ;;  %v416_v13 = vsel %vm3308_vm3, %v411_v59, %v415_v32  ;;  %v515_v14 = vrot.slane %v513_v63, 4  ;;  %v426_v20 = vsel %vm3308_vm3, %v421_v0, %v425_v49  ;;  %v3490_v57 = vld [vmem:[%s3281_s19 + $0x20] sm:$0x1] }
  0x4b   : > { %v889_v21 = vunpack.c.l.b16 %v416_v13  ;;  %v506_v22 = vor.u32 %v505_v5, %v502_v60  ;;  %v521_v25 = vrot.slane %v519_v7, 5  ;;  %v890_v26 = vunpack.c.l.b16 %v426_v20 }
  0x4c   : > { %2650 = vmatmul.msk.bf16.gmra.mxu0 %vm925_vm4, %v3460_v9  ;;  %v516_v27 = vor.u32 %v515_v14, %v511_v6  ;;  %v599_v31 = vshll.u32 %v3458_v8, 16  ;;  %v605_v33 = vshll.u32 %v3465_v16, 16  ;;  %v609_v41 = vshrl.u32 %v3465_v16, 16 }
  0x4d   : > { %v507_v32 = vrot.slane %v506_v22, 4  ;;  %v615_v42 = vshll.u32 %v3468_v17, 16  ;;  %v3479_v44 = vpack.c.b16 %v890_v26, %v889_v21  ;;  %v598_v46 = vrot.slane %v596_v30, 4  ;;  %v3502_v26 = vld [vmem:[%s3281_s19 + $0x54] sm:$0xf] }
  0x4e   : > { %v517_v45 = vrot.slane %v516_v27, 4  ;;  %v601_v49 = vrot.slane %v599_v31, 5  ;;  %v607_v54 = vrot.slane %v605_v33, 5  ;;  %v611_v55 = vrot.slane %v609_v41, 4  ;;  %v3546_v17 = vld [vmem:[%s3281_s19 + $0xb4] sm:$0xf] }
  0x4f   : > { %4634 = vst [vmem:[#allocation14_spill] sm:$0xff] %v3479_v44  ;;  %v512_v53 = vsel %vm3308_vm3, %v507_v32, %v511_v6  ;;  %2655 = vmatmul.msk.bf16.gmra.mxu1 %vm925_vm4, %v3479_v44  ;;  %v617_v0 = vrot.slane %v615_v42, 5  ;;  %v308_v6 = vshrl.u32 %v3482_v52, 16  ;;  %v311_v13 = vshll.u32 %v3482_v52, 16  ;;  %v3507_v32 = vld [vmem:[%s3281_s19 + $0x58] sm:$0xf] }
  0x50   : > { %v522_v59 = vsel %vm3308_vm3, %v517_v45, %v521_v25  ;;  %v897_v60 = vunpack.c.l.b16 %v512_v53  ;;  %v602_v63 = vor.u32 %v601_v49, %v598_v46  ;;  %v612_v7 = vor.u32 %v611_v55, %v607_v54  ;;  %v3512_v46 = vld [vmem:[%s3281_s19 + $0x5c] sm:$0x1]  ;;  %4637 = vst [vmem:[#allocation17_spill] sm:$0xff] %v3546_v17 }
  0x51   : > { %v898_v5 = vunpack.c.l.b16 %v522_v59  ;;  %v317_v20 = vshll.u32 %v3487_v56, 16  ;;  %v321_v21 = vshrl.u32 %v3487_v56, 16  ;;  %v327_v22 = vshll.u32 %v3490_v57, 16 }
  0x52   : > { %v603_v14 = vrot.slane %v602_v63, 4  ;;  %v613_v27 = vrot.slane %v612_v7, 4  ;;  %v310_v30 = vrot.slane %v308_v6, 4  ;;  %v313_v31 = vrot.slane %v311_v13, 5  ;;  %v3522_v7 = vld [vmem:[%s3281_s19 + $0x84] sm:$0xf] }
  0x53   : > { %v3504_v25 = vpack.c.b16 %v898_v5, %v897_v60  ;;  %v319_v41 = vrot.slane %v317_v20, 5  ;;  %v323_v42 = vrot.slane %v321_v21, 4  ;;  %v329_v45 = vrot.slane %v327_v22, 5  ;;  %4635 = vst [vmem:[#allocation15_spill] sm:$0xff] %v3522_v7 }
  0x54   : > { %v608_v33 = vsel %vm3308_vm3, %v603_v14, %v607_v54  ;;  %v618_v49 = vsel %vm3308_vm3, %v613_v27, %v617_v0  ;;  %v314_v55 = vor.u32 %v313_v31, %v310_v30  ;;  %v428_v59 = vshrl.u32 %v3502_v26, 16  ;;  %v3529_v30 = vld [vmem:[%s3281_s19 + $0x88] sm:$0xf] }
  0x55   : > { %2659 = vmatmul.msk.bf16.gmra.mxu2 %vm925_vm4, %v3504_v25  ;;  %v905_v53 = vunpack.c.l.b16 %v608_v33  ;;  %v906_v60 = vunpack.c.l.b16 %v618_v49  ;;  %v324_v63 = vor.u32 %v323_v42, %v319_v41  ;;  %v431_v54 = vshll.u32 %v3502_v26, 16  ;;  %v3534_v49 = vld [vmem:[%s3281_s19 + $0x8c] sm:$0x1] }
  0x56   : > { %v437_v5 = vshll.u32 %v3507_v32, 16  ;;  %v315_v6 = vrot.slane %v314_v55, 4  ;;  %v430_v13 = vrot.slane %v428_v59, 4  ;;  %v441_v14 = vshrl.u32 %v3507_v32, 16 }
  0x57   : > { %v447_v0 = vshll.u32 %v3512_v46, 16  ;;  %v3526_v20 = vpack.c.b16 %v906_v60, %v905_v53  ;;  %v325_v21 = vrot.slane %v324_v63, 4  ;;  %v433_v22 = vrot.slane %v431_v54, 5 }
  0x58   : > { %v439_v27 = vrot.slane %v437_v5, 5  ;;  %v320_v31 = vsel %vm3308_vm3, %v315_v6, %v319_v41  ;;  %v443_v33 = vrot.slane %v441_v14, 4  ;;  %v524_v55 = vshrl.u32 %v3522_v7, 16 }
  0x59   : > { %4636 = vst [vmem:[#allocation16_spill] sm:$0xff] %v3526_v20  ;;  %v449_v42 = vrot.slane %v447_v0, 5  ;;  %2663 = vmatmul.msk.bf16.gmra.mxu3 %vm925_vm4, %v3526_v20  ;;  %v330_v53 = vsel %vm3308_vm3, %v325_v21, %v329_v45  ;;  %v881_v59 = vunpack.c.l.b16 %v320_v31  ;;  %v434_v60 = vor.u32 %v433_v22, %v430_v13  ;;  %v3551_v22 = vld [vmem:[%s3281_s19 + $0xb8] sm:$0xf] }
  0x5a   : > { %v527_v63 = vshll.u32 %v3522_v7, 16  ;;  %v882_v54 = vunpack.c.l.b16 %v330_v53  ;;  %v444_v41 = vor.u32 %v443_v33, %v439_v27  ;;  %v526_v5 = vrot.slane %v524_v55, 4  ;;  %4638 = vst [vmem:[#allocation18_spill] sm:$0xff] %v3551_v22 }
  0x5b   : > { %v533_v6 = vshll.u32 %v3529_v30, 16  ;;  %v435_v14 = vrot.slane %v434_v60, 4  ;;  %v537_v8 = vshrl.u32 %v3529_v30, 16  ;;  %v543_v20 = vshll.u32 %v3534_v49, 16  ;;  %v3556_v60 = vld [vmem:[%s3281_s19 + $0xbc] sm:$0x1] }
  0x5c   : > { %v529_v0 = vrot.slane %v527_v63, 5  ;;  %v3548_v45 = vpack.c.b16 %v882_v54, %v881_v59  ;;  %v445_v21 = vrot.slane %v444_v41, 4  ;;  %4639 = vst [vmem:[#allocation19_spill] sm:$0xff] %v3556_v60  ;;  %v620_v54 = vshrl.u32 %v3546_v17, 16 }
  0x5d   : > { %v535_v13 = vrot.slane %v533_v6, 5  ;;  %v440_v31 = vsel %vm3308_vm3, %v435_v14, %v439_v27  ;;  %v539_v55 = vrot.slane %v537_v8, 4  ;;  %v545_v53 = vrot.slane %v543_v20, 5 }
  0x5e   : > { %v530_v33 = vor.u32 %v529_v0, %v526_v5  ;;  %2651 = vmatmul.msk.bf16.gmra.mxu0 %vm925_vm4, %v3548_v45  ;;  %v450_v59 = vsel %vm3308_vm3, %v445_v21, %v449_v42  ;;  %v891_v63 = vunpack.c.l.b16 %v440_v31  ;;  %v623_v41 = vshll.u32 %v3546_v17, 16 }
  0x5f   : > { %v892_v6 = vunpack.c.l.b16 %v450_v59  ;;  %v540_v5 = vor.u32 %v539_v55, %v535_v13  ;;  %v629_v8 = vshll.u32 %v3551_v22, 16  ;;  %v622_v20 = vrot.slane %v620_v54, 4 }
  0x60   : > { %v531_v27 = vrot.slane %v530_v33, 4  ;;  %v625_v14 = vrot.slane %v623_v41, 5  ;;  %v633_v0 = vshrl.u32 %v3551_v22, 16  ;;  %v639_v16 = vshll.u32 %v3556_v60, 16  ;;  %v3575_v33 = vld [vmem:[%s3281_s19 + $0x28] sm:$0xf] }
  0x61   : > { %v3570_v42 = vpack.c.b16 %v892_v6, %v891_v63  ;;  %v541_v31 = vrot.slane %v540_v5, 4  ;;  %v631_v59 = vrot.slane %v629_v8, 5  ;;  %v699_v55 = vrot.slane %v3328_v2, 5 }
  0x62   : > { %v536_v21 = vsel %vm3308_vm3, %v531_v27, %v535_v13  ;;  %v626_v54 = vor.u32 %v625_v14, %v622_v20  ;;  %v635_v41 = vrot.slane %v633_v0, 4  ;;  %v641_v6 = vrot.slane %v639_v16, 5 }
  0x63   : > { %4640 = vst [vmem:[#allocation20_spill] sm:$0xff] %v3570_v42  ;;  %v899_v17 = vunpack.c.l.b16 %v536_v21  ;;  %2656 = vmatmul.msk.bf16.gmra.mxu1 %vm925_vm4, %v3570_v42  ;;  %v546_v63 = vsel %vm3308_vm3, %v541_v31, %v545_v53  ;;  %v332_v13 = vshrl.u32 %v3568_v40, 16  ;;  %v335_v27 = vshll.u32 %v3568_v40, 16 }
  0x64   : > { %v900_v5 = vunpack.c.l.b16 %v546_v63  ;;  %v627_v8 = vrot.slane %v626_v54, 4  ;;  %v636_v60 = vor.u32 %v635_v41, %v631_v59  ;;  %v341_v2 = vshll.u32 %v3575_v33, 16  ;;  %v2817_v54 = vld [vmem:[%s4581_s1 + $0xc] sm:$0x3]  ;;  %v2838_v41 = vld [vmem:[%s4581_s1 + $0xe] sm:$0x3] }
  0x65   : > { %v334_v20 = vrot.slane %v332_v13, 4  ;;  %v337_v14 = vrot.slane %v335_v27, 5  ;;  %v345_v0 = vshrl.u32 %v3575_v33, 16  ;;  %v351_v21 = vshll.u32 %v3579_v39, 16 }
  0x66   : > { %v3590_v22 = vpack.c.b16 %v900_v5, %v899_v17  ;;  %v632_v16 = vsel %vm3308_vm3, %v627_v8, %v631_v59  ;;  %v637_v53 = vrot.slane %v636_v60, 4  ;;  %v343_v31 = vrot.slane %v341_v2, 5  ;;  %v2800_v17 = vld [vmem:[%s4581_s1 + $0xa] sm:$0x3]  ;;  %v2855_v60 = vld [vmem:[%s4581_s1 + $0x10] sm:$0x3] }
  0x67   : > { %v907_v63 = vunpack.c.l.b16 %v632_v16  ;;  %v338_v13 = vor.u32 %v337_v14, %v334_v20  ;;  %v347_v27 = vrot.slane %v345_v0, 4  ;;  %v353_v7 = vrot.slane %v351_v21, 5 }
  0x68   : > { %4641 = vst [vmem:[#allocation21_spill] sm:$0xff] %v3590_v22  ;;  %2660 = vmatmul.msk.bf16.gmra.mxu2 %vm925_vm4, %v3590_v22  ;;  %v642_v59 = vsel %vm3308_vm3, %v637_v53, %v641_v6  ;;  %v2630_v5 = vrot.slane %v3318_v61, 9  ;;  %v696_v0 = vrot.slane %v3325_v1, 5  ;;  %v1882_v21 = vsel %vm974_vm0, %v2817_v54, 0 }
  0x69   : > { %v908_v8 = vunpack.c.l.b16 %v642_v59  ;;  %v339_v2 = vrot.slane %v338_v13, 4  ;;  %v348_v20 = vor.u32 %v347_v27, %v343_v31  ;;  %v2014_v16 = vsel %vm974_vm0, %v2838_v41, 0  ;;  %1891 = vmatpush.bf16.msra.mxu2 %v1882_v21  ;;  %v2880_v21 = vld [vmem:[%s3281_s19 + $0xc] sm:$0xff] }
  0x6a   : > { %v1750_v22 = vsel %vm974_vm0, %v2800_v17, 0  ;;  %v2146_v6 = vsel %vm974_vm0, %v2855_v60, 0  ;;  %v697_v27 = vsel %vm3611_vm7, %v2630_v5, %v696_v0  ;;  %2023 = vmatpush.bf16.msra.mxu3 %v2014_v16  ;;  %v698_v54 = vrot.slane %v696_v0, 4 }
  0x6b   : > { %v3620_v53 = vpack.c.b16 %v908_v8, %v907_v63  ;;  %v344_v61 = vsel %vm3308_vm3, %v339_v2, %v343_v31  ;;  %v349_v13 = vrot.slane %v348_v20, 4  ;;  %1759 = vmatpush.bf16.msra.mxu1 %v1750_v22  ;;  %2155 = vmatpush.bf16.msra.mxu0 %v2146_v6  ;;  %v2631_v41 = vrot.slane %v3392_v35, 9  ;;  %v2879_v22 = vld [vmem:[%s3281_s19] sm:$0xff]  ;;  %v3657_v6 = vld [vmem:[%s3281_s19 + $0x18] sm:$0xff] }
  0x6c   : > { %v883_v1 = vunpack.c.l.b16 %v344_v61  ;;  %v1257_v31 = vunpack.c.l.b16 %v697_v27  ;;  %v703_v17 = vrot.slane %v3399_v43, 5  ;;  %v706_v60 = vrot.slane %v3402_v48, 5 }
  0x6d   : > { %2664 = vmatmul.msk.bf16.gmra.mxu3 %vm925_vm4, %v3620_v53  ;;  %v354_v63 = vsel %vm3308_vm3, %v349_v13, %v353_v7  ;;  %v700_v5 = vsel %vm3611_vm7, %v698_v54, %v699_v55  ;;  %v710_v16 = vrot.slane %v3487_v56, 5  ;;  %v2632_v61 = vrot.slane %v3482_v52, 9 }
  0x6e   : > { %v884_v59 = vunpack.c.l.b16 %v354_v63  ;;  %v1258_v8 = vunpack.c.l.b16 %v700_v5  ;;  %v704_v35 = vsel %vm3611_vm7, %v2631_v41, %v703_v17  ;;  %v705_v2 = vrot.slane %v703_v17, 4  ;;  %v3677_v41 = vld [vmem:[%s3281_s19 + $0x24] sm:$0xff] }
  0x6f   : > { %v1259_v7 = vunpack.c.l.b16 %v704_v35  ;;  %v712_v13 = vrot.slane %v710_v16, 4  ;;  %v713_v27 = vrot.slane %v3490_v57, 5  ;;  %v717_v57 = vrot.slane %v3575_v33, 5 }
  0x70   : > { %v3638_v20 = vpack.c.b16 %v884_v59, %v883_v1  ;;  %v1289_v0 = vpack.c.b16 %v1258_v8, %v1257_v31  ;;  %v707_v43 = vsel %vm3611_vm7, %v705_v2, %v706_v60  ;;  %v2633_v63 = vrot.slane %v3568_v40, 9  ;;  %v3699_v8 = vld [vmem:[%s3281_s19 + $0x30] sm:$0xff] }
  0x71   : > { %v1260_v48 = vunpack.c.l.b16 %v707_v43  ;;  %v714_v56 = vsel %vm3611_vm7, %v712_v13, %v713_v27  ;;  %v719_v31 = vrot.slane %v717_v57, 4  ;;  %v720_v17 = vrot.slane %v3579_v39, 5  ;;  %v3727_v27 = vld [vmem:[%s3281_s19 + $0x3c] sm:$0xff] }
  0x72   : > { %2652 = vmatmul.msk.bf16.gmra.mxu0 %vm925_vm4, %v3638_v20  ;;  %v1262_v54 = vunpack.c.l.b16 %v714_v56  ;;  %v718_v60 = vsel %vm3611_vm7, %v2633_v63, %v717_v57  ;;  %v724_v39 = vrot.slane %v3287_v11, 5  ;;  %v2634_v35 = vrot.slane %v3284_v10, 9 }
  0x73   : > { %2729 = vmatmul.msk.bf16.vlgmr.msrb.gmra.mxu1 %vm925_vm4, %v2879_v22  ;;  %v3645_v55 = vpack.c.b16 %v1260_v48, %v1259_v7  ;;  %v721_v33 = vsel %vm3611_vm7, %v719_v31, %v720_v17  ;;  %v1263_v59 = vunpack.c.l.b16 %v718_v60  ;;  %v727_v7 = vrot.slane %v3290_v12, 5 }
  0x74   : > { %v1264_v5 = vunpack.c.l.b16 %v721_v33  ;;  %v726_v2 = vrot.slane %v724_v39, 4  ;;  %v731_v13 = vrot.slane %v3347_v24, 5  ;;  %v2635_v56 = vrot.slane %v3344_v23, 9 }
  0x76   : > { %v3691_v40 = vpack.c.b16 %v1264_v5, %v1263_v59  ;;  %v728_v11 = vsel %vm3611_vm7, %v726_v2, %v727_v7  ;;  %v732_v24 = vsel %vm3611_vm7, %v2635_v56, %v731_v13  ;;  %v738_v5 = vrot.slane %v3417_v3, 5 }
  0x77   : > { %v1267_v23 = vunpack.c.l.b16 %v732_v24  ;;  %v2636_v7 = vrot.slane %v3412_v58, 9  ;;  %v745_v24 = vrot.slane %v3507_v32, 5 }
  0x78   : > { %2746 = vmatmul.msk.bf16.vlgmr.msrb.gmra.mxu2 %vm925_vm4, %v1289_v0  ;;  %v725_v0 = vsel %vm3611_vm7, %v2634_v35, %v724_v39  ;;  %v3761_v35 = vld [vmem:[%s3281_s19 + $0x48] sm:$0xff] }
  0x79   : > { %v1265_v48 = vunpack.c.l.b16 %v725_v0  ;;  %4646 = vst [vmem:[#allocation24_spill] sm:$0xff] %v3761_v35  ;;  %v740_v0 = vrot.slane %v738_v5, 4 }
  0x7d   : > { %2767 = vmatmul.msk.bf16.vlgmr.msrb.gmra.mxu3 %vm925_vm4, %v2880_v21 }
  0x82   : > { %2784 = vmatmul.msk.bf16.vlgmr.msrb.gmra.mxu0 %vm925_vm4, %v3460_v9  ;;  %v711_v9 = vsel %vm3611_vm7, %v2632_v61, %v710_v16 }
  0x83   : > { %2730 = vmatmul.msk.bf16.gmra.mxu1 %vm925_vm4, %v2880_v21  ;;  %v1261_v1 = vunpack.c.l.b16 %v711_v9  ;;  %v1266_v21 = vunpack.c.l.b16 %v728_v11  ;;  %v741_v11 = vrot.slane %v3424_v15, 5 }
  0x85   : > { %v3671_v52 = vpack.c.b16 %v1262_v54, %v1261_v1  ;;  %v3719_v12 = vpack.c.b16 %v1266_v21, %v1265_v48  ;;  %v733_v1 = vrot.slane %v731_v13, 4  ;;  %v734_v54 = vrot.slane %v3352_v29, 5 }
  0x86   : > { %v739_v21 = vsel %vm3611_vm7, %v2636_v7, %v738_v5  ;;  %v742_v13 = vsel %vm3611_vm7, %v740_v0, %v741_v11  ;;  %v2637_v5 = vrot.slane %v3502_v26, 9  ;;  %v747_v7 = vrot.slane %v745_v24, 4 }
  0x87   : > { %v735_v63 = vsel %vm3611_vm7, %v733_v1, %v734_v54  ;;  %v1269_v56 = vunpack.c.l.b16 %v739_v21  ;;  %v1270_v1 = vunpack.c.l.b16 %v742_v13  ;;  %v748_v0 = vrot.slane %v3512_v46, 5 }
  0x88   : > { %2747 = vmatmul.msk.bf16.gmra.mxu2 %vm925_vm4, %v3645_v55  ;;  %v1268_v60 = vunpack.c.l.b16 %v735_v63  ;;  %v746_v32 = vsel %vm3611_vm7, %v2637_v5, %v745_v24  ;;  %v752_v5 = vrot.slane %v3299_v19, 5 }
  0x89   : > { %v3785_v54 = vpack.c.b16 %v1270_v1, %v1269_v56  ;;  %v749_v13 = vsel %vm3611_vm7, %v747_v7, %v748_v0  ;;  %v1271_v56 = vunpack.c.l.b16 %v746_v32  ;;  %v3059_v32 = vld [vmem:[%s3281_s19 + $0x68] sm:$0x1] }
  0x8a   : > { %v3751_v33 = vpack.c.b16 %v1268_v60, %v1267_v23  ;;  %v3795_v60 = vld [vmem:[%s3281_s19 + $0x54] sm:$0xff]  ;;  %v1272_v46 = vunpack.c.l.b16 %v749_v13  ;;  %v755_v13 = vrot.slane %v3059_v32, 5 }
  0x8b   : > { %4649 = vst [vmem:[#allocation27_spill] sm:$0xff] %v3785_v54 }
  0x8c   : > { %4650 = vst [vmem:[#allocation28_spill] sm:$0xff] %v3795_v60 }
  0x8d   : > { %2768 = vmatmul.msk.bf16.gmra.mxu3 %vm925_vm4, %v3657_v6 }
  0x92   : > { %2785 = vmatmul.msk.bf16.gmra.mxu0 %vm925_vm4, %v3548_v45 }
  0x93   : > { %2731 = vmatmul.msk.bf16.gmra.mxu1 %vm925_vm4, %v3657_v6 }
  0x98   : > { %2748 = vmatmul.msk.bf16.gmra.mxu2 %vm925_vm4, %v3671_v52 }
  0x9d   : > { %2769 = vmatmul.msk.bf16.gmra.mxu3 %vm925_vm4, %v3677_v41 }
  0xa2   : > { %2786 = vmatmul.msk.bf16.gmra.mxu0 %vm925_vm4, %v3638_v20 }
  0xa3   : > { %2732 = vmatmul.msk.bf16.gmra.mxu1 %vm925_vm4, %v3677_v41 }
  0xa8   : > { %v3694_v22 = vpop.f32.mrf.mxu1  ;;  %2749 = vmatmul.msk.bf16.gmra.mxu2 %vm925_vm4, %v3691_v40 }
  0xad   : > { %2770 = vmatmul.msk.bf16.gmra.mxu3 %vm925_vm4, %v3699_v8 }
  0xb0   : > { %v3709_v43 = vpop.f32.mrf.mxu1 }
  0xb2   : > { %v3711_v16 = vpop.f32.mrf.mxu2  ;;  %2787 = vmatmul.msk.bf16.gmra.mxu0 %vm925_vm4, %v3320_v62 }
  0xb3   : > { %2733 = vmatmul.msk.bf16.gmra.mxu1 %vm925_vm4, %v3699_v8 }
  0xb5   : > { %v3717_v10 = vpop.f32.mrf.mxu0 }
  0xb6   : > { %v3721_v61 = vpop.f32.mrf.mxu3 }
  0xb7   : > { %4644 = vst [vmem:[#allocation22_spill] sm:$0xff] %v3721_v61 }
  0xb8   : > { %2750 = vmatmul.msk.bf16.gmra.mxu2 %vm925_vm4, %v3719_v12 }
  0xba   : > { %v3729_v9 = vpop.f32.mrf.mxu1  ;;  %v3733_v57 = vpop.f32.mrf.mxu2 }
  0xbd   : > { %2771 = vmatmul.msk.bf16.gmra.mxu3 %vm925_vm4, %v3727_v27  ;;  %v3741_v31 = vpop.f32.mrf.mxu0 }
  0xbe   : > { %v3743_v17 = vpop.f32.mrf.mxu3 }
  0xbf   : > { %4645 = vst [vmem:[#allocation23_spill] sm:$0xff] %v3743_v17 }
  0xc2   : > { %2788 = vmatmul.msk.bf16.gmra.mxu0 %vm925_vm4, %v3394_v37  ;;  %v3747_v29 = vpop.f32.mrf.mxu1 }
  0xc3   : > { %2734 = vmatmul.msk.bf16.gmra.mxu1 %vm925_vm4, %v3727_v27 }
  0xc5   : > { %v3753_v59 = vpop.f32.mrf.mxu2 }
  0xc8   : > { %2751 = vmatmul.msk.bf16.gmra.mxu2 %vm925_vm4, %v3751_v33 }
  0xc9   : > { %v3756_v39 = vpop.f32.mrf.mxu0 }
  0xca   : > { %v3763_v2 = vpop.f32.mrf.mxu3 }
  0xcb   : > { %4647 = vst [vmem:[#allocation25_spill] sm:$0xff] %v3763_v2 }
  0xcc   : > { %v3767_v48 = vpop.f32.mrf.mxu1 }
  0xcd   : > { %2772 = vmatmul.msk.bf16.gmra.mxu3 %vm925_vm4, %v3761_v35  ;;  %v3771_v3 = vpop.f32.mrf.mxu2 }
  0xd1   : > { %v3777_v58 = vpop.f32.mrf.mxu0 }
  0xd2   : > { %2789 = vmatmul.msk.bf16.gmra.mxu0 %vm925_vm4, %v3479_v44  ;;  %v3781_v15 = vpop.f32.mrf.mxu3 }
  0xd3   : > { %4648 = vst [vmem:[#allocation26_spill] sm:$0xff] %v3781_v15  ;;  %2735 = vmatmul.msk.bf16.gmra.mxu1 %vm925_vm4, %v3761_v35  ;;  %v3830_v15 = vld [vmem:[%s3281_s19 + $0x60] sm:$0xff] }
  0xd4   : > { %v3788_v63 = vpop.f32.mrf.mxu1  ;;  %4654 = vst [vmem:[#allocation32_spill] sm:$0xff] %v3830_v15 }
  0xd8   : > { %v3790_v23 = vpop.f32.mrf.mxu2  ;;  %2752 = vmatmul.msk.bf16.gmra.mxu2 %vm925_vm4, %v3785_v54 }
  0xdb   : > { %v3799_v11 = vpop.f32.mrf.mxu0 }
  0xdc   : > { %v3801_v21 = vpop.f32.mrf.mxu3 }
  0xdd   : > { %4651 = vst [vmem:[#allocation29_spill] sm:$0xff] %v3801_v21  ;;  %2773 = vmatmul.msk.bf16.gmra.mxu3 %vm925_vm4, %v3795_v60  ;;  %v3817_v21 = vpack.c.b16 %v1272_v46, %v1271_v56 }
  0xdf   : > { %4652 = vst [vmem:[#allocation30_spill] sm:$0xff] %v3817_v21 }
  0xe0   : > { %v3809_v26 = vpop.f32.mrf.mxu1  ;;  %v3811_v1 = vpop.f32.mrf.mxu2 }
  0xe2   : > { %2790 = vmatmul.msk.bf16.gmra.mxu0 %vm925_vm4, %v3570_v42  ;;  %v3060_v42 = vld [vmem:[%s3281_s19 + $0x60] sm:$0xf] }
  0xe3   : > { %2736 = vmatmul.msk.bf16.gmra.mxu1 %vm925_vm4, %v3795_v60  ;;  %v3819_v24 = vpop.f32.mrf.mxu0  ;;  %v2638_v2 = vrot.slane %v3060_v42, 9  ;;  %v754_v60 = vrot.slane %v752_v5, 4 }
  0xe4   : > { %v3822_v7 = vpop.f32.mrf.mxu3 }
  0xe5   : > { %4653 = vst [vmem:[#allocation31_spill] sm:$0xff] %v3822_v7  ;;  %v753_v19 = vsel %vm3611_vm7, %v2638_v2, %v752_v5  ;;  %v756_v46 = vsel %vm3611_vm7, %v754_v60, %v755_v13  ;;  %v759_v60 = vrot.slane %v3367_v47, 5 }
  0xe6   : > { %v1273_v17 = vunpack.c.l.b16 %v753_v19  ;;  %v1274_v42 = vunpack.c.l.b16 %v756_v46  ;;  %v3863_v19 = vld [vmem:[%s3281_s19 + $0x6c] sm:$0xff] }
  0xe8   : > { %2753 = vmatmul.msk.bf16.gmra.mxu2 %vm925_vm4, %v3817_v21  ;;  %v3826_v0 = vpop.f32.mrf.mxu1  ;;  %v3852_v2 = vpack.c.b16 %v1274_v42, %v1273_v17  ;;  %v761_v17 = vrot.slane %v759_v60, 4 }
  0xea   : > { %4656 = vst [vmem:[#allocation34_spill] sm:$0xff] %v3852_v2 }
  0xeb   : > { %v3833_v56 = vpop.f32.mrf.mxu2 }
  0xed   : > { %2774 = vmatmul.msk.bf16.gmra.mxu3 %vm925_vm4, %v3830_v15 }
  0xef   : > { %v3841_v7 = vpop.f32.mrf.mxu0 }
  0xf0   : > { %v3843_v32 = vpop.f32.mrf.mxu3  ;;  %v1175_v21 = vpop.f32.mrf.mxu1 }
  0xf1   : > { %4655 = vst [vmem:[#allocation33_spill] sm:$0xff] %v3843_v32  ;;  %v1176_v54 = vadd.f32 %v1175_v21, %v3717_v10  ;;  %v762_v21 = vrot.slane %v3374_v51, 5  ;;  %v2639_v32 = vrot.slane %v3360_v38, 9 }
  0xf2   : > { %2791 = vmatmul.msk.bf16.gmra.mxu0 %vm925_vm4, %v3339_v18 }
  0xf3   : > { %v3848_v44 = vpop.f32.mrf.mxu2  ;;  %2737 = vmatmul.msk.bf16.gmra.mxu1 %vm925_vm4, %v3830_v15  ;;  %v760_v47 = vsel %vm3611_vm7, %v2639_v32, %v759_v60 }
  0xf4   : > { %v1275_v61 = vunpack.c.l.b16 %v760_v47 }
  0xf7   : > { %v3855_v5 = vpop.f32.mrf.mxu0 }
  0xf8   : > { %v3857_v13 = vpop.f32.mrf.mxu3  ;;  %2754 = vmatmul.msk.bf16.gmra.mxu2 %vm925_vm4, %v3852_v2  ;;  %v1177_v10 = vpop.f32.mrf.mxu1 }
  0xf9   : > { %4657 = vst [vmem:[#allocation35_spill] sm:$0xff] %v3857_v13  ;;  %v1178_v46 = vadd.f32 %v1177_v10, %v3741_v31  ;;  %v763_v13 = vsel %vm3611_vm7, %v761_v17, %v762_v21  ;;  %v766_v21 = vrot.slane %v3439_v34, 5 }
  0xfa   : > { %v1276_v35 = vunpack.c.l.b16 %v763_v13  ;;  %v769_v13 = vrot.slane %v3446_v50, 5 }
  0xfb   : > { %v1365_v42 = vpop.f32.mrf.mxu2 }
  0xfc   : > { %v1445_v18 = vadd.f32 %v1365_v42, %v1176_v54  ;;  %v3880_v10 = vpack.c.b16 %v1276_v35, %v1275_v61  ;;  %v3887_v42 = vld [vmem:[%s3281_s19 + $0x78] sm:$0xff] }
  0xfd   : > { %2775 = vmatmul.msk.bf16.gmra.mxu3 %vm925_vm4, %v3863_v19 }
  0xff   : > { %v1629_v2 = vpop.f32.mrf.mxu0 }
 0x100   : > { %v1497_v51 = vpop.f32.mrf.mxu3  ;;  %v1180_v15 = vpop.f32.mrf.mxu1 }
 0x101   : > { %v1577_v31 = vadd.f32 %v1497_v51, %v1445_v18  ;;  %v1181_v38 = vadd.f32 %v1180_v15, %v3756_v39 }
 0x102   : > { %2792 = vmatmul.msk.bf16.gmra.mxu0 %vm925_vm4, %v3419_v4 }
 0x103   : > { %v1367_v54 = vpop.f32.mrf.mxu2  ;;  %2738 = vmatmul.msk.bf16.gmra.mxu1 %vm925_vm4, %v3863_v19  ;;  %v3878_v32 = vadd.f32 %v1629_v2, %v1577_v31  ;;  %v2640_v2 = vrot.slane %v3435_v28, 9 }
 0x104   : > { %v1446_v60 = vadd.f32 %v1367_v54, %v1178_v46  ;;  %v768_v46 = vrot.slane %v766_v21, 4 }
 0x105   : > { %v767_v50 = vsel %vm3611_vm7, %v2640_v2, %v766_v21 }
 0x106   : > { %v770_v51 = vsel %vm3611_vm7, %v768_v46, %v769_v13  ;;  %v776_v46 = vrot.slane %v3534_v49, 5 }
 0x107   : > { %v1631_v17 = vpop.f32.mrf.mxu0 }
 0x108   : > { %v1499_v18 = vpop.f32.mrf.mxu3  ;;  %2755 = vmatmul.msk.bf16.gmra.mxu2 %vm925_vm4, %v3880_v10  ;;  %v1182_v39 = vpop.f32.mrf.mxu1 }
 0x109   : > { %v1578_v15 = vadd.f32 %v1499_v18, %v1446_v60  ;;  %v1183_v47 = vadd.f32 %v1182_v39, %v3777_v58  ;;  %v1277_v58 = vunpack.c.l.b16 %v767_v50  ;;  %v1278_v18 = vunpack.c.l.b16 %v770_v51  ;;  %v3913_v50 = vld [vmem:[%s3281_s19 + $0x84] sm:$0xff] }
 0x10b   : > { %v1370_v61 = vpop.f32.mrf.mxu2  ;;  %v3891_v35 = vadd.f32 %v1631_v17, %v1578_v15  ;;  %v3906_v13 = vpack.c.b16 %v1278_v18, %v1277_v58  ;;  %v773_v15 = vrot.slane %v3529_v30, 5 }
 0x10c   : > { %v1447_v34 = vadd.f32 %v1370_v61, %v1181_v38 }
 0x10d   : > { %2776 = vmatmul.msk.bf16.gmra.mxu3 %vm925_vm4, %v3887_v42 }
 0x10f   : > { %v1634_v31 = vpop.f32.mrf.mxu0 }
 0x110   : > { %v1502_v54 = vpop.f32.mrf.mxu3  ;;  %v1185_v60 = vpop.f32.mrf.mxu1 }
 0x111   : > { %v1579_v28 = vadd.f32 %v1502_v54, %v1447_v34  ;;  %v1186_v17 = vadd.f32 %v1185_v60, %v3799_v11 }
 0x112   : > { %2793 = vmatmul.msk.bf16.gmra.mxu0 %vm925_vm4, %v3504_v25 }
 0x113   : > { %v1372_v38 = vpop.f32.mrf.mxu2  ;;  %2739 = vmatmul.msk.bf16.gmra.mxu1 %vm925_vm4, %v3887_v42  ;;  %v3904_v21 = vadd.f32 %v1634_v31, %v1579_v28  ;;  %v4659_v31 = vld [vmem:[#allocation15_spill] sm:$0xff] }
 0x114   : > { %v1448_v39 = vadd.f32 %v1372_v38, %v1183_v47  ;;  %v2641_v54 = vrot.slane %v4659_v31, 9  ;;  %v775_v47 = vrot.slane %v773_v15, 4 }
 0x115   : > { %4658 = vst [vmem:[#allocation36_spill] sm:$0xff] %v3904_v21 }
 0x116   : > { %v774_v49 = vsel %vm3611_vm7, %v2641_v54, %v773_v15  ;;  %v777_v18 = vsel %vm3611_vm7, %v775_v47, %v776_v46  ;;  %v3061_v54 = vld [vmem:[%s3281_s19 + $0x94] sm:$0xf] }
 0x117   : > { %v1636_v2 = vpop.f32.mrf.mxu0  ;;  %v780_v47 = vrot.slane %v3061_v54, 5 }
 0x118   : > { %v1504_v61 = vpop.f32.mrf.mxu3  ;;  %2756 = vmatmul.msk.bf16.gmra.mxu2 %vm925_vm4, %v3906_v13  ;;  %v1187_v11 = vpop.f32.mrf.mxu1 }
 0x119   : > { %v1580_v34 = vadd.f32 %v1504_v61, %v1448_v39  ;;  %v1188_v51 = vadd.f32 %v1187_v11, %v3819_v24  ;;  %v1279_v39 = vunpack.c.l.b16 %v774_v49  ;;  %v1280_v61 = vunpack.c.l.b16 %v777_v18 }
 0x11b   : > { %v1375_v60 = vpop.f32.mrf.mxu2  ;;  %v3917_v58 = vadd.f32 %v1636_v2, %v1580_v34  ;;  %v3932_v31 = vpack.c.b16 %v1280_v61, %v1279_v39 }
 0x11c   : > { %v1449_v30 = vadd.f32 %v1375_v60, %v1186_v17  ;;  %v4661_v17 = vld [vmem:[#allocation21_spill] sm:$0xff] }
 0x11d   : > { %4660 = vst [vmem:[#allocation15_spill] sm:$0xff] %v3917_v58  ;;  %2777 = vmatmul.msk.bf16.gmra.mxu3 %vm925_vm4, %v3913_v50 }
 0x11e   : > { %4663 = vst [vmem:[#allocation37_spill] sm:$0xff] %v3932_v31 }
 0x11f   : > { %v1639_v28 = vpop.f32.mrf.mxu0 }
 0x120   : > { %v1507_v24 = vpop.f32.mrf.mxu3  ;;  %v1190_v38 = vpop.f32.mrf.mxu1 }
 0x121   : > { %v1581_v11 = vadd.f32 %v1507_v24, %v1449_v30  ;;  %v1191_v2 = vadd.f32 %v1190_v38, %v3841_v7  ;;  %v3062_v30 = vld [vmem:[%s3281_s19 + $0x98] sm:$0x1]  ;;  %v3939_v38 = vld [vmem:[%s3281_s19 + $0x90] sm:$0xff] }
 0x122   : > { %2794 = vmatmul.msk.bf16.gmra.mxu0 %vm925_vm4, %v4661_v17  ;;  %v783_v49 = vrot.slane %v3062_v30, 5  ;;  %4664 = vst [vmem:[#allocation38_spill] sm:$0xff] %v3939_v38 }
 0x123   : > { %v1377_v34 = vpop.f32.mrf.mxu2  ;;  %2740 = vmatmul.msk.bf16.gmra.mxu1 %vm925_vm4, %v3913_v50  ;;  %v3930_v15 = vadd.f32 %v1639_v28, %v1581_v11  ;;  %v3063_v28 = vld [vmem:[%s3281_s19 + $0x90] sm:$0xf] }
 0x124   : > { %v1450_v46 = vadd.f32 %v1377_v34, %v1188_v51  ;;  %v2642_v11 = vrot.slane %v3063_v28, 9  ;;  %v782_v51 = vrot.slane %v780_v47, 4 }
 0x125   : > { %4662 = vst [vmem:[#allocation21_spill] sm:$0xff] %v3930_v15 }
 0x126   : > { %v781_v54 = vsel %vm3611_vm7, %v2642_v11, %v780_v47  ;;  %v3064_v11 = vld [vmem:[%s3281_s19 + $0xa0] sm:$0xf] }
 0x127   : > { %v1641_v60 = vpop.f32.mrf.mxu0 }
 0x128   : > { %v1509_v7 = vpop.f32.mrf.mxu3  ;;  %2757 = vmatmul.msk.bf16.gmra.mxu2 %vm925_vm4, %v3932_v31  ;;  %v1192_v18 = vpop.f32.mrf.mxu1  ;;  %v3066_v31 = vld [vmem:[%s3281_s19 + $0x9c] sm:$0xf] }
 0x129   : > { %v1582_v24 = vadd.f32 %v1509_v7, %v1450_v46  ;;  %v1193_v58 = vadd.f32 %v1192_v18, %v3855_v5  ;;  %v784_v46 = vsel %vm3611_vm7, %v782_v51, %v783_v49  ;;  %v1281_v18 = vunpack.c.l.b16 %v781_v54 }
 0x12a   : > { %v1282_v28 = vunpack.c.l.b16 %v784_v46  ;;  %v787_v51 = vrot.slane %v3064_v11, 5  ;;  %v3065_v46 = vld [vmem:[%s3281_s19 + $0xa4] sm:$0x1] }
 0x12b   : > { %v1380_v39 = vpop.f32.mrf.mxu2  ;;  %v3943_v61 = vadd.f32 %v1641_v60, %v1582_v24  ;;  %v4666_v60 = vld [vmem:[#allocation9_spill] sm:$0xff] }
 0x12c   : > { %v1451_v34 = vadd.f32 %v1380_v39, %v1191_v2  ;;  %v3957_v49 = vpack.c.b16 %v1282_v28, %v1281_v18 }
 0x12d   : > { %4665 = vst [vmem:[#allocation39_spill] sm:$0xff] %v3943_v61  ;;  %2778 = vmatmul.msk.bf16.gmra.mxu3 %vm925_vm4, %v3939_v38 }
 0x12e   : > { %4668 = vst [vmem:[#allocation41_spill] sm:$0xff] %v3957_v49 }
 0x12f   : > { %v1644_v30 = vpop.f32.mrf.mxu0 }
 0x130   : > { %v1512_v7 = vpop.f32.mrf.mxu3  ;;  %v1195_v5 = vpop.f32.mrf.mxu1 }
 0x131   : > { %v1583_v15 = vadd.f32 %v1512_v7, %v1451_v34  ;;  %v790_v7 = vrot.slane %v3065_v46, 5 }
 0x132   : > { %2795 = vmatmul.msk.bf16.gmra.mxu0 %vm925_vm4, %v4666_v60  ;;  %v3964_v60 = vld [vmem:[%s3281_s19 + $0x9c] sm:$0xff] }
 0x133   : > { %v1382_v2 = vpop.f32.mrf.mxu2  ;;  %2741 = vmatmul.msk.bf16.gmra.mxu1 %vm925_vm4, %v3939_v38  ;;  %v3955_v47 = vadd.f32 %v1644_v30, %v1583_v15  ;;  %4669 = vst [vmem:[#allocation42_spill] sm:$0xff] %v3964_v60  ;;  %v2643_v38 = vrot.slane %v3066_v31, 9  ;;  %v789_v15 = vrot.slane %v787_v51, 4 }
 0x134   : > { %v1452_v24 = vadd.f32 %v1382_v2, %v1193_v58  ;;  %v1196_v58 = vadd.f32 %v1195_v5, %v3694_v22  ;;  %v4671_v5 = vld [vmem:[#allocation10_spill] sm:$0xff] }
 0x135   : > { %4667 = vst [vmem:[#allocation40_spill] sm:$0xff] %v3955_v47  ;;  %v788_v2 = vsel %vm3611_vm7, %v2643_v38, %v787_v51 }
 0x136   : > { %v1283_v31 = vunpack.c.l.b16 %v788_v2 }
 0x137   : > { %v1646_v39 = vpop.f32.mrf.mxu0 }
 0x138   : > { %v1514_v54 = vpop.f32.mrf.mxu3  ;;  %2758 = vmatmul.msk.bf16.gmra.mxu2 %vm925_vm4, %v3957_v49  ;;  %v1197_v34 = vpop.f32.mrf.mxu1 }
 0x139   : > { %v1584_v61 = vadd.f32 %v1514_v54, %v1452_v24  ;;  %v791_v24 = vsel %vm3611_vm7, %v789_v15, %v790_v7  ;;  %v4674_v15 = vld [vmem:[#allocation12_spill] sm:$0xff] }
 0x13a   : > { %v1284_v47 = vunpack.c.l.b16 %v791_v24  ;;  %v4675_v24 = vld [vmem:[#allocation13_spill] sm:$0xff] }
 0x13b   : > { %v1385_v30 = vpop.f32.mrf.mxu2  ;;  %v3968_v18 = vadd.f32 %v1646_v39, %v1584_v61  ;;  %v1198_v61 = vadd.f32 %v1197_v34, %v3709_v43  ;;  %v3990_v34 = vld [vmem:[%s3281_s19 + $0xa8] sm:$0xff] }
 0x13c   : > { %v1453_v28 = vadd.f32 %v1385_v30, %v1196_v58  ;;  %v3983_v7 = vpack.c.b16 %v1284_v47, %v1283_v31  ;;  %v794_v58 = vrot.slane %v4674_v15, 5  ;;  %4676 = vst [vmem:[#allocation12_spill] sm:$0xff] %v3990_v34 }
 0x13d   : > { %4670 = vst [vmem:[#allocation43_spill] sm:$0xff] %v3968_v18  ;;  %2779 = vmatmul.msk.bf16.gmra.mxu3 %vm925_vm4, %v3964_v60  ;;  %v4677_v18 = vld [vmem:[#allocation11_spill] sm:$0xff] }
 0x13e   : > { %4673 = vst [vmem:[#allocation45_spill] sm:$0xff] %v3983_v7 }
 0x13f   : > { %v1649_v11 = vpop.f32.mrf.mxu0 }
 0x140   : > { %v1517_v54 = vpop.f32.mrf.mxu3  ;;  %v1200_v46 = vpop.f32.mrf.mxu1 }
 0x141   : > { %v1585_v22 = vadd.f32 %v1517_v54, %v1453_v28  ;;  %v797_v54 = vrot.slane %v4675_v24, 5 }
 0x142   : > { %2796 = vmatmul.msk.bf16.gmra.mxu0 %vm925_vm4, %v4671_v5  ;;  %v2644_v5 = vrot.slane %v4677_v18, 9 }
 0x143   : > { %v1387_v39 = vpop.f32.mrf.mxu2  ;;  %2742 = vmatmul.msk.bf16.gmra.mxu1 %vm925_vm4, %v3964_v60  ;;  %v3981_v38 = vadd.f32 %v1649_v11, %v1585_v22  ;;  %v796_v11 = vrot.slane %v794_v58, 4  ;;  %v1201_v22 = vadd.f32 %v1200_v46, %v3729_v9 }
 0x144   : > { %v1454_v51 = vadd.f32 %v1387_v39, %v1198_v61  ;;  %v795_v39 = vsel %vm3611_vm7, %v2644_v5, %v794_v58  ;;  %v4008_v5 = vld [vmem:[%s3281_s19 + $0xc0] sm:$0xf] }
 0x145   : > { %4672 = vst [vmem:[#allocation44_spill] sm:$0xff] %v3981_v38  ;;  %v1285_v24 = vunpack.c.l.b16 %v795_v39  ;;  %v4679_v38 = vld [vmem:[#allocation16_spill] sm:$0xff]  ;;  %v807_v39 = vshrl.u32 %v4008_v5, 16 }
 0x146   : > { %4680 = vst [vmem:[#allocation11_spill] sm:$0xff] %v4008_v5 }
 0x147   : > { %v1651_v30 = vpop.f32.mrf.mxu0 }
 0x148   : > { %v1519_v2 = vpop.f32.mrf.mxu3  ;;  %2759 = vmatmul.msk.bf16.gmra.mxu2 %vm925_vm4, %v3983_v7  ;;  %v1202_v28 = vpop.f32.mrf.mxu1 }
 0x149   : > { %v1586_v43 = vadd.f32 %v1519_v2, %v1454_v51  ;;  %v798_v51 = vsel %vm3611_vm7, %v796_v11, %v797_v54 }
 0x14a   : > { %v1286_v9 = vunpack.c.l.b16 %v798_v51 }
 0x14b   : > { %v1390_v47 = vpop.f32.mrf.mxu2  ;;  %v3994_v31 = vadd.f32 %v1651_v30, %v1586_v43  ;;  %v1203_v30 = vadd.f32 %v1202_v28, %v3747_v29  ;;  %v810_v29 = vshll.u32 %v4008_v5, 16 }
 0x14c   : > { %v1455_v61 = vadd.f32 %v1390_v47, %v1201_v22  ;;  %v4012_v11 = vpack.c.b16 %v1286_v9, %v1285_v24  ;;  %v4015_v22 = vld [vmem:[%s3281_s19 + $0xc4] sm:$0xf]  ;;  %v4684_v47 = vld [vmem:[#allocation18_spill] sm:$0xff]  ;;  %v4685_v24 = vld [vmem:[#allocation19_spill] sm:$0xff] }
 0x14d   : > { %4678 = vst [vmem:[#allocation13_spill] sm:$0xff] %v3994_v31  ;;  %2780 = vmatmul.msk.bf16.gmra.mxu3 %vm925_vm4, %v3990_v34  ;;  %v816_v28 = vshll.u32 %v4015_v22, 16  ;;  %v804_v9 = vrot.slane %v4685_v24, 5  ;;  %v812_v7 = vrot.slane %v810_v29, 5 }
 0x14e   : > { %4682 = vst [vmem:[#allocation47_spill] sm:$0xff] %v4012_v11 }
 0x14f   : > { %v1654_v15 = vpop.f32.mrf.mxu0  ;;  %4683 = vst [vmem:[#allocation48_spill] sm:$0xff] %v4015_v22 }
 0x150   : > { %v1522_v18 = vpop.f32.mrf.mxu3  ;;  %v1205_v2 = vpop.f32.mrf.mxu1 }
 0x151   : > { %v1587_v46 = vadd.f32 %v1522_v18, %v1455_v61  ;;  %v801_v61 = vrot.slane %v4684_v47, 5  ;;  %v820_v18 = vshrl.u32 %v4015_v22, 16  ;;  %v1206_v5 = vadd.f32 %v1205_v2, %v3767_v48 }
 0x152   : > { %2797 = vmatmul.msk.bf16.gmra.mxu0 %vm925_vm4, %v4679_v38  ;;  %v809_v38 = vrot.slane %v807_v39, 4  ;;  %v818_v22 = vrot.slane %v816_v28, 5 }
 0x153   : > { %v1392_v43 = vpop.f32.mrf.mxu2  ;;  %2743 = vmatmul.msk.bf16.gmra.mxu1 %vm925_vm4, %v3990_v34  ;;  %v4010_v58 = vadd.f32 %v1654_v15, %v1587_v46  ;;  %v822_v60 = vrot.slane %v820_v18, 4 }
 0x154   : > { %v1456_v54 = vadd.f32 %v1392_v43, %v1203_v30  ;;  %v4026_v30 = vld [vmem:[%s3281_s19 + $0xb4] sm:$0xff]  ;;  %v4686_v43 = vld [vmem:[#allocation17_spill] sm:$0xff]  ;;  %v813_v2 = vor.u32 %v812_v7, %v809_v38 }
 0x155   : > { %4681 = vst [vmem:[#allocation46_spill] sm:$0xff] %v4010_v58  ;;  %v2645_v47 = vrot.slane %v4686_v43, 9  ;;  %v803_v58 = vrot.slane %v801_v61, 4  ;;  %v823_v39 = vor.u32 %v822_v60, %v818_v22 }
 0x157   : > { %v1656_v51 = vpop.f32.mrf.mxu0  ;;  %v824_v38 = vrot.slane %v823_v39, 4 }
 0x158   : > { %v1524_v31 = vpop.f32.mrf.mxu3  ;;  %2760 = vmatmul.msk.bf16.gmra.mxu2 %vm925_vm4, %v4012_v11  ;;  %v1207_v15 = vpop.f32.mrf.mxu1  ;;  %v4033_v11 = vld [vmem:[%s3281_s19 + $0xc8] sm:$0x1] }
 0x159   : > { %v1588_v46 = vadd.f32 %v1524_v31, %v1456_v54  ;;  %v802_v31 = vsel %vm3611_vm7, %v2645_v47, %v801_v61  ;;  %v805_v54 = vsel %vm3611_vm7, %v803_v58, %v804_v9  ;;  %v826_v29 = vshll.u32 %v4033_v11, 16 }
 0x15a   : > { %v1287_v18 = vunpack.c.l.b16 %v802_v31  ;;  %v1208_v24 = vadd.f32 %v1207_v15, %v3788_v63  ;;  %v814_v58 = vrot.slane %v813_v2, 4 }
 0x15b   : > { %v1395_v34 = vpop.f32.mrf.mxu2  ;;  %v4030_v49 = vadd.f32 %v1656_v51, %v1588_v46  ;;  %v828_v60 = vrot.slane %v826_v29, 5 }
 0x15c   : > { %v1457_v21 = vadd.f32 %v1395_v34, %v1206_v5  ;;  %v1288_v34 = vunpack.c.l.b16 %v805_v54  ;;  %v4058_v54 = vld [vmem:[%s3281_s19 + $0xc0] sm:$0xff] }
 0x15d   : > { %2781 = vmatmul.msk.bf16.gmra.mxu3 %vm925_vm4, %v4026_v30  ;;  %v829_v63 = vsel %vm3308_vm3, %v824_v38, %v828_v60 }
 0x15e   : > { %v4049_v46 = vpack.c.b16 %v1288_v34, %v1287_v18  ;;  %v1612_v39 = vunpack.c.l.b16 %v829_v63 }
 0x15f   : > { %v1659_v48 = vpop.f32.mrf.mxu0 }
 0x160   : > { %v1527_v28 = vpop.f32.mrf.mxu3  ;;  %v1210_v51 = vpop.f32.mrf.mxu1 }
 0x161   : > { %v1589_v5 = vadd.f32 %v1527_v28, %v1457_v21  ;;  %v819_v21 = vsel %vm3308_vm3, %v814_v58, %v818_v22 }
 0x162   : > { %2798 = vmatmul.msk.bf16.gmra.mxu0 %vm925_vm4, %v3620_v53  ;;  %v1611_v2 = vunpack.c.l.b16 %v819_v21 }
 0x163   : > { %v1397_v61 = vpop.f32.mrf.mxu2  ;;  %2744 = vmatmul.msk.bf16.gmra.mxu1 %vm925_vm4, %v4026_v30  ;;  %v4047_v7 = vadd.f32 %v1659_v48, %v1589_v5  ;;  %v1211_v48 = vadd.f32 %v1210_v51, %v3809_v26 }
 0x164   : > { %v1458_v9 = vadd.f32 %v1397_v61, %v1208_v24  ;;  %v4065_v22 = vpack.c.b16 %v1612_v39, %v1611_v2 }
 0x167   : > { %v1661_v43 = vpop.f32.mrf.mxu0 }
 0x168   : > { %v1529_v15 = vpop.f32.mrf.mxu3  ;;  %2761 = vmatmul.msk.bf16.gmra.mxu2 %vm925_vm4, %v4049_v46  ;;  %v1212_v47 = vpop.f32.mrf.mxu1 }
 0x169   : > { %v1590_v31 = vadd.f32 %v1529_v15, %v1458_v9  ;;  %v1213_v26 = vadd.f32 %v1212_v47, %v3826_v0 }
 0x16b   : > { %v1400_v29 = vpop.f32.mrf.mxu2  ;;  %v4061_v28 = vadd.f32 %v1661_v43, %v1590_v31 }
 0x16c   : > { %v1459_v18 = vadd.f32 %v1400_v29, %v1211_v48 }
 0x16d   : > { %2782 = vmatmul.msk.bf16.gmra.mxu3 %vm925_vm4, %v4058_v54 }
 0x16f   : > { %v1664_v34 = vpop.f32.mrf.mxu0 }
 0x170   : > { %v1532_v5 = vpop.f32.mrf.mxu3  ;;  %v1215_v24 = vpop.f32.mrf.mxu1 }
 0x171   : > { %v1591_v61 = vadd.f32 %v1532_v5, %v1459_v18  ;;  %v1216_v63 = vadd.f32 %v1215_v24, %v3711_v16 }
 0x172   : > { %2799 = vmatmul.msk.bf16.gmra.mxu0 %vm925_vm4, %v4065_v22 }
 0x173   : > { %v1402_v51 = vpop.f32.mrf.mxu2  ;;  %2801 = vmatmul.msk.bf16.vlgmr.msra.gmra.mxu1 %vm925_vm4, %v3645_v55  ;;  %v4072_v58 = vadd.f32 %v1664_v34, %v1591_v61 }
 0x174   : > { %v1460_v38 = vadd.f32 %v1402_v51, %v1213_v26 }
 0x177   : > { %v1666_v60 = vpop.f32.mrf.mxu0 }
 0x178   : > { %v1534_v9 = vpop.f32.mrf.mxu3  ;;  %2822 = vmatmul.msk.bf16.vlgmr.msra.gmra.mxu2 %vm925_vm4, %v3657_v6  ;;  %v1217_v43 = vpop.f32.mrf.mxu1 }
 0x179   : > { %v1592_v21 = vadd.f32 %v1534_v9, %v1460_v38  ;;  %v1218_v6 = vadd.f32 %v1217_v43, %v3733_v57 }
 0x17b   : > { %v1405_v15 = vpop.f32.mrf.mxu2  ;;  %v4077_v31 = vadd.f32 %v1666_v60, %v1592_v21 }
 0x17c   : > { %v1461_v0 = vadd.f32 %v1405_v15, %v1216_v63 }
 0x17d   : > { %2839 = vmatmul.msk.bf16.vlgmr.msra.gmra.mxu3 %vm925_vm4, %v3548_v45 }
 0x17f   : > { %v1669_v55 = vpop.f32.mrf.mxu0 }
 0x180   : > { %v1537_v47 = vpop.f32.mrf.mxu3  ;;  %v1220_v48 = vpop.f32.mrf.mxu1 }
 0x181   : > { %v1593_v2 = vadd.f32 %v1537_v47, %v1461_v0  ;;  %v1221_v24 = vadd.f32 %v1220_v48, %v3753_v59 }
 0x182   : > { %2856 = vmatmul.msk.bf16.vlgmr.msra.gmra.mxu0 %vm925_vm4, %v3671_v52 }
 0x183   : > { %v1407_v39 = vpop.f32.mrf.mxu2  ;;  %2802 = vmatmul.msk.bf16.gmra.mxu1 %vm925_vm4, %v3671_v52  ;;  %v4086_v16 = vadd.f32 %v1669_v55, %v1593_v2 }
 0x184   : > { %v1462_v29 = vadd.f32 %v1407_v39, %v1218_v6 }
 0x187   : > { %v1671_v18 = vpop.f32.mrf.mxu0 }
 0x188   : > { %v1539_v34 = vpop.f32.mrf.mxu3  ;;  %2823 = vmatmul.msk.bf16.gmra.mxu2 %vm925_vm4, %v3677_v41  ;;  %v1222_v45 = vpop.f32.mrf.mxu1 }
 0x189   : > { %v1594_v5 = vadd.f32 %v1539_v34, %v1462_v29  ;;  %v1223_v41 = vadd.f32 %v1222_v45, %v3771_v3 }
 0x18b   : > { %v1410_v61 = vpop.f32.mrf.mxu2  ;;  %v4091_v26 = vadd.f32 %v1671_v18, %v1594_v5 }
 0x18c   : > { %v1463_v57 = vadd.f32 %v1410_v61, %v1221_v24 }
 0x18d   : > { %2840 = vmatmul.msk.bf16.gmra.mxu3 %vm925_vm4, %v3638_v20 }
 0x18f   : > { %v1674_v52 = vpop.f32.mrf.mxu0 }
 0x190   : > { %v1542_v51 = vpop.f32.mrf.mxu3  ;;  %v1225_v38 = vpop.f32.mrf.mxu1 }
 0x191   : > { %v1595_v60 = vadd.f32 %v1542_v51, %v1463_v57  ;;  %v1226_v0 = vadd.f32 %v1225_v38, %v3790_v23 }
 0x192   : > { %2857 = vmatmul.msk.bf16.gmra.mxu0 %vm925_vm4, %v3691_v40 }
 0x193   : > { %v1412_v9 = vpop.f32.mrf.mxu2  ;;  %2803 = vmatmul.msk.bf16.gmra.mxu1 %vm925_vm4, %v3691_v40  ;;  %v4100_v59 = vadd.f32 %v1674_v52, %v1595_v60 }
 0x194   : > { %v1464_v43 = vadd.f32 %v1412_v9, %v1223_v41 }
 0x197   : > { %v1676_v21 = vpop.f32.mrf.mxu0 }
 0x198   : > { %v1544_v63 = vpop.f32.mrf.mxu3  ;;  %2824 = vmatmul.msk.bf16.gmra.mxu2 %vm925_vm4, %v3699_v8  ;;  %v1227_v20 = vpop.f32.mrf.mxu1 }
 0x199   : > { %v1596_v15 = vadd.f32 %v1544_v63, %v1464_v43  ;;  %v1228_v8 = vadd.f32 %v1227_v20, %v3811_v1  ;;  %v4687_v43 = vld [vmem:[#allocation24_spill] sm:$0xff]  ;;  %v4688_v63 = vld [vmem:[#allocation22_spill] sm:$0xff] }
 0x19b   : > { %v1415_v55 = vpop.f32.mrf.mxu2  ;;  %v4105_v47 = vadd.f32 %v1676_v21, %v1596_v15 }
 0x19c   : > { %v1465_v3 = vadd.f32 %v1415_v55, %v1226_v0  ;;  %v4689_v55 = vld [vmem:[#allocation14_spill] sm:$0xff] }
 0x19d   : > { %2841 = vmatmul.msk.bf16.gmra.mxu3 %vm925_vm4, %v3320_v62 }
 0x19f   : > { %v1679_v40 = vpop.f32.mrf.mxu0 }
 0x1a0   : > { %v1547_v48 = vpop.f32.mrf.mxu3  ;;  %v1230_v2 = vpop.f32.mrf.mxu1 }
 0x1a1   : > { %v1597_v6 = vadd.f32 %v1547_v48, %v1465_v3  ;;  %v1231_v5 = vadd.f32 %v1230_v2, %v3833_v56  ;;  %v4690_v2 = vld [vmem:[#allocation27_spill] sm:$0xff] }
 0x1a2   : > { %2858 = vmatmul.msk.bf16.gmra.mxu0 %vm925_vm4, %v3719_v12 }
 0x1a3   : > { %v1417_v39 = vpop.f32.mrf.mxu2  ;;  %2804 = vmatmul.msk.bf16.gmra.mxu1 %vm925_vm4, %v3719_v12  ;;  %v4114_v23 = vadd.f32 %v1679_v40, %v1597_v6  ;;  %v4691_v6 = vld [vmem:[#allocation23_spill] sm:$0xff] }
 0x1a4   : > { %v1466_v29 = vadd.f32 %v1417_v39, %v1228_v8 }
 0x1a7   : > { %v1681_v18 = vpop.f32.mrf.mxu0 }
 0x1a8   : > { %v1549_v34 = vpop.f32.mrf.mxu3  ;;  %2825 = vmatmul.msk.bf16.gmra.mxu2 %vm925_vm4, %v3727_v27  ;;  %v1232_v62 = vpop.f32.mrf.mxu1 }
 0x1a9   : > { %v1598_v45 = vadd.f32 %v1549_v34, %v1466_v29  ;;  %v1233_v27 = vadd.f32 %v1232_v62, %v3848_v44 }
 0x1ab   : > { %v1420_v24 = vpop.f32.mrf.mxu2  ;;  %v4119_v61 = vadd.f32 %v1681_v18, %v1598_v45  ;;  %v4692_v45 = vld [vmem:[#allocation28_spill] sm:$0xff] }
 0x1ac   : > { %v1467_v1 = vadd.f32 %v1420_v24, %v1231_v5 }
 0x1ad   : > { %2842 = vmatmul.msk.bf16.gmra.mxu3 %vm925_vm4, %v3394_v37 }
 0x1af   : > { %v1684_v12 = vpop.f32.mrf.mxu0 }
 0x1b0   : > { %v1552_v57 = vpop.f32.mrf.mxu3  ;;  %v1235_v52 = vpop.f32.mrf.mxu1 }
 0x1b1   : > { %v1599_v51 = vadd.f32 %v1552_v57, %v1467_v1  ;;  %v1236_v20 = vadd.f32 %v1235_v52, %v4688_v63  ;;  %v4693_v1 = vld [vmem:[#allocation25_spill] sm:$0xff] }
 0x1b2   : > { %2859 = vmatmul.msk.bf16.gmra.mxu0 %vm925_vm4, %v3751_v33 }
 0x1b3   : > { %v1422_v38 = vpop.f32.mrf.mxu2  ;;  %2805 = vmatmul.msk.bf16.gmra.mxu1 %vm925_vm4, %v3751_v33  ;;  %v4128_v56 = vadd.f32 %v1684_v12, %v1599_v51 }
 0x1b4   : > { %v1468_v60 = vadd.f32 %v1422_v38, %v1233_v27  ;;  %v4694_v27 = vld [vmem:[#allocation20_spill] sm:$0xff] }
 0x1b7   : > { %v1686_v41 = vpop.f32.mrf.mxu0 }
 0x1b8   : > { %v1554_v9 = vpop.f32.mrf.mxu3  ;;  %2826 = vmatmul.msk.bf16.gmra.mxu2 %vm925_vm4, %v4687_v43  ;;  %v1237_v37 = vpop.f32.mrf.mxu1  ;;  %v4695_v43 = vld [vmem:[#allocation30_spill] sm:$0xff] }
 0x1b9   : > { %v1600_v21 = vadd.f32 %v1554_v9, %v1468_v60  ;;  %v1238_v8 = vadd.f32 %v1237_v37, %v4691_v6  ;;  %v4696_v37 = vld [vmem:[#allocation26_spill] sm:$0xff] }
 0x1bb   : > { %v1425_v15 = vpop.f32.mrf.mxu2  ;;  %v4133_v0 = vadd.f32 %v1686_v41, %v1600_v21 }
 0x1bc   : > { %v1469_v44 = vadd.f32 %v1425_v15, %v1236_v20 }
 0x1bd   : > { %2843 = vmatmul.msk.bf16.gmra.mxu3 %vm925_vm4, %v4689_v55 }
 0x1bf   : > { %v1689_v33 = vpop.f32.mrf.mxu0 }
 0x1c0   : > { %v1557_v3 = vpop.f32.mrf.mxu3  ;;  %v1240_v40 = vpop.f32.mrf.mxu1 }
 0x1c1   : > { %v1601_v48 = vadd.f32 %v1557_v3, %v1469_v44  ;;  %v1241_v12 = vadd.f32 %v1240_v40, %v4693_v1  ;;  %v4701_v1 = vld [vmem:[#allocation31_spill] sm:$0xff] }
 0x1c2   : > { %2860 = vmatmul.msk.bf16.gmra.mxu0 %vm925_vm4, %v4690_v2 }
 0x1c3   : > { %v1427_v39 = vpop.f32.mrf.mxu2  ;;  %2806 = vmatmul.msk.bf16.gmra.mxu1 %vm925_vm4, %v4690_v2  ;;  %v4142_v29 = vadd.f32 %v1689_v33, %v1601_v48  ;;  %v4697_v33 = vld [vmem:[#allocation32_spill] sm:$0xff]  ;;  %v4698_v48 = vld [vmem:[#allocation29_spill] sm:$0xff] }
 0x1c4   : > { %v1470_v18 = vadd.f32 %v1427_v39, %v1238_v8 }
 0x1c7   : > { %v1691_v34 = vpop.f32.mrf.mxu0 }
 0x1c8   : > { %v1559_v62 = vpop.f32.mrf.mxu3  ;;  %2827 = vmatmul.msk.bf16.gmra.mxu2 %vm925_vm4, %v4692_v45  ;;  %v1242_v5 = vpop.f32.mrf.mxu1 }
 0x1c9   : > { %v1602_v24 = vadd.f32 %v1559_v62, %v1470_v18  ;;  %v1243_v21 = vadd.f32 %v1242_v5, %v4696_v37  ;;  %v4699_v18 = vld [vmem:[#allocation8_spill] sm:$0xff] }
 0x1cb   : > { %v1430_v57 = vpop.f32.mrf.mxu2  ;;  %v4147_v52 = vadd.f32 %v1691_v34, %v1602_v24  ;;  %v4700_v24 = vld [vmem:[#allocation34_spill] sm:$0xff] }
 0x1cc   : > { %v1471_v51 = vadd.f32 %v1430_v57, %v1241_v12 }
 0x1cd   : > { %2844 = vmatmul.msk.bf16.gmra.mxu3 %vm925_vm4, %v4694_v27 }
 0x1cf   : > { %v1694_v38 = vpop.f32.mrf.mxu0 }
 0x1d0   : > { %v1562_v60 = vpop.f32.mrf.mxu3  ;;  %v1245_v41 = vpop.f32.mrf.mxu1 }
 0x1d1   : > { %v1603_v9 = vadd.f32 %v1562_v60, %v1471_v51  ;;  %v1246_v2 = vadd.f32 %v1245_v41, %v4698_v48 }
 0x1d2   : > { %2861 = vmatmul.msk.bf16.gmra.mxu0 %vm925_vm4, %v4695_v43 }
 0x1d3   : > { %v1432_v63 = vpop.f32.mrf.mxu2  ;;  %2807 = vmatmul.msk.bf16.gmra.mxu1 %vm925_vm4, %v4695_v43  ;;  %v4156_v20 = vadd.f32 %v1694_v38, %v1603_v9  ;;  %v4702_v43 = vld [vmem:[#allocation33_spill] sm:$0xff] }
 0x1d4   : > { %v1472_v15 = vadd.f32 %v1432_v63, %v1243_v21 }
 0x1d7   : > { %v1696_v44 = vpop.f32.mrf.mxu0 }
 0x1d8   : > { %v1564_v55 = vpop.f32.mrf.mxu3  ;;  %2828 = vmatmul.msk.bf16.gmra.mxu2 %vm925_vm4, %v4697_v33  ;;  %v1247_v3 = vpop.f32.mrf.mxu1 }
 0x1d9   : > { %v1604_v40 = vadd.f32 %v1564_v55, %v1472_v15  ;;  %v1248_v12 = vadd.f32 %v1247_v3, %v4701_v1 }
 0x1db   : > { %v1435_v6 = vpop.f32.mrf.mxu2  ;;  %v4161_v8 = vadd.f32 %v1696_v44, %v1604_v40  ;;  %v4703_v40 = vld [vmem:[#allocation35_spill] sm:$0xff] }
 0x1dc   : > { %v1473_v39 = vadd.f32 %v1435_v6, %v1246_v2 }
 0x1dd   : > { %2845 = vmatmul.msk.bf16.gmra.mxu3 %vm925_vm4, %v4699_v18 }
 0x1df   : > { %v1699_v34 = vpop.f32.mrf.mxu0 }
 0x1e0   : > { %v1567_v62 = vpop.f32.mrf.mxu3  ;;  %v1250_v45 = vpop.f32.mrf.mxu1 }
 0x1e1   : > { %v1605_v5 = vadd.f32 %v1567_v62, %v1473_v39  ;;  %v1251_v37 = vadd.f32 %v1250_v45, %v4702_v43 }
 0x1e2   : > { %2862 = vmatmul.msk.bf16.gmra.mxu0 %vm925_vm4, %v4700_v24 }
 0x1e3   : > { %v1437_v57 = vpop.f32.mrf.mxu2  ;;  %2808 = vmatmul.msk.bf16.gmra.mxu1 %vm925_vm4, %v4700_v24  ;;  %v4170_v51 = vadd.f32 %v1699_v34, %v1605_v5 }
 0x1e4   : > { %v1474_v27 = vadd.f32 %v1437_v57, %v1248_v12 }
 0x1e7   : > { %v1701_v38 = vpop.f32.mrf.mxu0 }
 0x1e8   : > { %v1569_v60 = vpop.f32.mrf.mxu3  ;;  %2829 = vmatmul.msk.bf16.gmra.mxu2 %vm925_vm4, %v3863_v19  ;;  %v1252_v41 = vpop.f32.mrf.mxu1 }
 0x1e9   : > { %v1606_v9 = vadd.f32 %v1569_v60, %v1474_v27  ;;  %v1253_v19 = vadd.f32 %v1252_v41, %v4703_v40 }
 0x1eb   : > { %v1440_v21 = vpop.f32.mrf.mxu2  ;;  %v4175_v63 = vadd.f32 %v1701_v38, %v1606_v9 }
 0x1ec   : > { %v1475_v15 = vadd.f32 %v1440_v21, %v1251_v37 }
 0x1ed   : > { %2846 = vmatmul.msk.bf16.gmra.mxu3 %vm925_vm4, %v3419_v4 }
 0x1ef   : > { %v1704_v44 = vpop.f32.mrf.mxu0 }
 0x1f0   : > { %v1572_v55 = vpop.f32.mrf.mxu3  ;;  %v1761_v33 = vpop.f32.mrf.mxu1 }
 0x1f1   : > { %v1607_v3 = vadd.f32 %v1572_v55, %v1475_v15  ;;  %v1841_v1 = vadd.f32 %v1761_v33, %v3878_v32  ;;  %v4704_v15 = vld [vmem:[#allocation36_spill] sm:$0xff]  ;;  %v4705_v55 = vld [vmem:[#allocation37_spill] sm:$0xff] }
 0x1f2   : > { %2863 = vmatmul.msk.bf16.gmra.mxu0 %vm925_vm4, %v3880_v10 }
 0x1f3   : > { %v1442_v48 = vpop.f32.mrf.mxu2  ;;  %2809 = vmatmul.msk.bf16.gmra.mxu1 %vm925_vm4, %v3880_v10  ;;  %v4184_v2 = vadd.f32 %v1704_v44, %v1607_v3  ;;  %v4706_v3 = vld [vmem:[#allocation15_spill] sm:$0xff] }
 0x1f4   : > { %v1476_v6 = vadd.f32 %v1442_v48, %v1253_v19 }
 0x1f7   : > { %v1706_v39 = vpop.f32.mrf.mxu0 }
 0x1f8   : > { %v1574_v18 = vpop.f32.mrf.mxu3  ;;  %2830 = vmatmul.msk.bf16.gmra.mxu2 %vm925_vm4, %v3887_v42  ;;  %v1763_v4 = vpop.f32.mrf.mxu1 }
 0x1f9   : > { %v1608_v34 = vadd.f32 %v1574_v18, %v1476_v6  ;;  %v1842_v42 = vadd.f32 %v1763_v4, %v3891_v35  ;;  %v4707_v18 = vld [vmem:[#allocation38_spill] sm:$0xff] }
 0x1fb   : > { %v1893_v62 = vpop.f32.mrf.mxu2  ;;  %v4188_v45 = vadd.f32 %v1706_v39, %v1608_v34 }
 0x1fc   : > { %v1973_v12 = vadd.f32 %v1893_v62, %v1841_v1  ;;  %v4708_v1 = vld [vmem:[#allocation9_spill] sm:$0xff] }
 0x1fd   : > { %2847 = vmatmul.msk.bf16.gmra.mxu3 %vm925_vm4, %v3504_v25 }
 0x1ff   : > { %v2157_v5 = vpop.f32.mrf.mxu0 }
 0x200   : > { %v2025_v24 = vpop.f32.mrf.mxu3  ;;  %v1766_v10 = vpop.f32.mrf.mxu1 }
 0x201   : > { %v2105_v25 = vadd.f32 %v2025_v24, %v1973_v12  ;;  %v1843_v44 = vadd.f32 %v1766_v10, %v4704_v15 }
 0x202   : > { %2864 = vmatmul.msk.bf16.gmra.mxu0 %vm925_vm4, %v3906_v13 }
 0x203   : > { %v1895_v57 = vpop.f32.mrf.mxu2  ;;  %2810 = vmatmul.msk.bf16.gmra.mxu1 %vm925_vm4, %v3906_v13  ;;  %v4204_v9 = vadd.f32 %v2157_v5, %v2105_v25 }
 0x204   : > { %v1974_v27 = vadd.f32 %v1895_v57, %v1842_v42 }
 0x207   : > { %v2159_v38 = vpop.f32.mrf.mxu0 }
 0x208   : > { %v2027_v60 = vpop.f32.mrf.mxu3  ;;  %2831 = vmatmul.msk.bf16.gmra.mxu2 %vm925_vm4, %v3913_v50  ;;  %v1768_v32 = vpop.f32.mrf.mxu1 }
 0x209   : > { %v2106_v41 = vadd.f32 %v2027_v60, %v1974_v27  ;;  %v1844_v40 = vadd.f32 %v1768_v32, %v4706_v3  ;;  %v4709_v27 = vld [vmem:[#allocation21_spill] sm:$0xff]  ;;  %v4711_v32 = vld [vmem:[#allocation39_spill] sm:$0xff] }
 0x20b   : > { %v4206_v35 = vadd.f32 %v2159_v38, %v2106_v41  ;;  %v1898_v43 = vpop.f32.mrf.mxu2  ;;  %v4710_v38 = vld [vmem:[#allocation41_spill] sm:$0xff] }
 0x20c   : > { %v1975_v33 = vadd.f32 %v1898_v43, %v1843_v44  ;;  %v4712_v44 = vld [vmem:[#allocation42_spill] sm:$0xff] }
 0x20d   : > { %v2901_v13 = vpack.c.bf16 %v4206_v35, %v4204_v9  ;;  %2848 = vmatmul.msk.bf16.gmra.mxu3 %vm925_vm4, %v4661_v17 }
 0x20f   : > { %2902 = vst [vmem:[%s4212_s7] sm:$0xff] %v2901_v13   ;;  %v2162_v37 = vpop.f32.mrf.mxu0 }
 0x210   : > { %v2030_v50 = vpop.f32.mrf.mxu3  ;;  %v1771_v21 = vpop.f32.mrf.mxu1 }
 0x211   : > { %v2107_v48 = vadd.f32 %v2030_v50, %v1975_v33  ;;  %v1845_v25 = vadd.f32 %v1771_v21, %v4709_v27 }
 0x212   : > { %2865 = vmatmul.msk.bf16.gmra.mxu0 %vm925_vm4, %v4705_v55 }
 0x213   : > { %v1900_v19 = vpop.f32.mrf.mxu2  ;;  %2811 = vmatmul.msk.bf16.gmra.mxu1 %vm925_vm4, %v4705_v55  ;;  %v4223_v62 = vadd.f32 %v2162_v37, %v2107_v48 }
 0x214   : > { %v1976_v17 = vadd.f32 %v1900_v19, %v1844_v40 }
 0x217   : > { %v2164_v6 = vpop.f32.mrf.mxu0 }
 0x218   : > { %v2032_v39 = vpop.f32.mrf.mxu3  ;;  %2832 = vmatmul.msk.bf16.gmra.mxu2 %vm925_vm4, %v4707_v18  ;;  %v1773_v4 = vpop.f32.mrf.mxu1  ;;  %v4714_v18 = vld [vmem:[#allocation40_spill] sm:$0xff] }
 0x219   : > { %v2108_v34 = vadd.f32 %v2032_v39, %v1976_v17  ;;  %v1846_v41 = vadd.f32 %v1773_v4, %v4711_v32  ;;  %v4713_v17 = vld [vmem:[#allocation10_spill] sm:$0xff] }
 0x21b   : > { %v4225_v5 = vadd.f32 %v2164_v6, %v2108_v34  ;;  %v1903_v24 = vpop.f32.mrf.mxu2  ;;  %v4715_v34 = vld [vmem:[#allocation45_spill] sm:$0xff] }
 0x21c   : > { %v1977_v60 = vadd.f32 %v1903_v24, %v1845_v25 }
 0x21d   : > { %v2906_v10 = vpack.c.bf16 %v4225_v5, %v4223_v62  ;;  %2849 = vmatmul.msk.bf16.gmra.mxu3 %vm925_vm4, %v4708_v1 }
 0x21f   : > { %2978 = vst [vmem:[%s4212_s7 + $0x8] sm:$0xff] %v2906_v10   ;;  %v2167_v12 = vpop.f32.mrf.mxu0  ;;  %v4716_v10 = vld [vmem:[#allocation43_spill] sm:$0xff] }
 0x220   : > { %v2035_v42 = vpop.f32.mrf.mxu3  ;;  %v1776_v57 = vpop.f32.mrf.mxu1 }
 0x221   : > { %v2109_v37 = vadd.f32 %v2035_v42, %v1977_v60  ;;  %v1847_v4 = vadd.f32 %v1776_v57, %v4714_v18  ;;  %v4717_v60 = vld [vmem:[#allocation12_spill] sm:$0xff] }
 0x222   : > { %2866 = vmatmul.msk.bf16.gmra.mxu0 %vm925_vm4, %v4710_v38 }
 0x223   : > { %v1905_v43 = vpop.f32.mrf.mxu2  ;;  %2812 = vmatmul.msk.bf16.gmra.mxu1 %vm925_vm4, %v4710_v38  ;;  %v4240_v33 = vadd.f32 %v2167_v12, %v2109_v37 }
 0x224   : > { %v1978_v13 = vadd.f32 %v1905_v43, %v1846_v41 }
 0x227   : > { %v2169_v50 = vpop.f32.mrf.mxu0 }
 0x228   : > { %v2037_v15 = vpop.f32.mrf.mxu3  ;;  %2833 = vmatmul.msk.bf16.gmra.mxu2 %vm925_vm4, %v4712_v44  ;;  %v1778_v55 = vpop.f32.mrf.mxu1 }
 0x229   : > { %v2110_v21 = vadd.f32 %v2037_v15, %v1978_v13  ;;  %v1848_v1 = vadd.f32 %v1778_v55, %v4716_v10 }
 0x22b   : > { %v4242_v3 = vadd.f32 %v2169_v50, %v2110_v21  ;;  %v1908_v40 = vpop.f32.mrf.mxu2  ;;  %v4718_v50 = vld [vmem:[#allocation16_spill] sm:$0xff] }
 0x22c   : > { %v1979_v24 = vadd.f32 %v1908_v40, %v1847_v4  ;;  %v4719_v21 = vld [vmem:[#allocation44_spill] sm:$0xff] }
 0x22d   : > { %v2911_v19 = vpack.c.bf16 %v4242_v3, %v4240_v33  ;;  %2850 = vmatmul.msk.bf16.gmra.mxu3 %vm925_vm4, %v4713_v17 }
 0x22f   : > { %2979 = vst [vmem:[%s4212_s7 + $0x10] sm:$0xff] %v2911_v19   ;;  %v2172_v48 = vpop.f32.mrf.mxu0  ;;  %v4720_v19 = vld [vmem:[#allocation47_spill] sm:$0xff] }
 0x230   : > { %v2040_v6 = vpop.f32.mrf.mxu3  ;;  %v1781_v39 = vpop.f32.mrf.mxu1 }
 0x231   : > { %v2111_v27 = vadd.f32 %v2040_v6, %v1979_v24  ;;  %v1849_v40 = vadd.f32 %v1781_v39, %v4719_v21 }
 0x232   : > { %2867 = vmatmul.msk.bf16.gmra.mxu0 %vm925_vm4, %v4715_v34 }
 0x233   : > { %v1910_v12 = vpop.f32.mrf.mxu2  ;;  %2813 = vmatmul.msk.bf16.gmra.mxu1 %vm925_vm4, %v4715_v34  ;;  %v4257_v41 = vadd.f32 %v2172_v48, %v2111_v27  ;;  %v4721_v48 = vld [vmem:[#allocation13_spill] sm:$0xff] }
 0x234   : > { %v1980_v42 = vadd.f32 %v1910_v12, %v1848_v1 }
 0x237   : > { %v2174_v25 = vpop.f32.mrf.mxu0 }
 0x238   : > { %v2042_v38 = vpop.f32.mrf.mxu3  ;;  %2834 = vmatmul.msk.bf16.gmra.mxu2 %vm925_vm4, %v4717_v60  ;;  %v1783_v32 = vpop.f32.mrf.mxu1  ;;  %v4722_v60 = vld [vmem:[#allocation48_spill] sm:$0xff] }
 0x239   : > { %v2112_v57 = vadd.f32 %v2042_v38, %v1980_v42  ;;  %v1850_v6 = vadd.f32 %v1783_v32, %v4721_v48  ;;  %v835_v32 = vrot.slane %v4722_v60, 5 }
 0x23b   : > { %v4259_v43 = vadd.f32 %v2174_v25, %v2112_v57  ;;  %v1913_v13 = vpop.f32.mrf.mxu2  ;;  %v4285_v57 = vld [vmem:[%s3281_s19 + $0xcc] sm:$0xf] }
 0x23c   : > { %v1981_v17 = vadd.f32 %v1913_v13, %v1849_v40  ;;  %v841_v40 = vshrl.u32 %v4285_v57, 16 }
 0x23d   : > { %v2916_v37 = vpack.c.bf16 %v4259_v43, %v4257_v41  ;;  %2851 = vmatmul.msk.bf16.gmra.mxu3 %vm925_vm4, %v4718_v50  ;;  %v4723_v50 = vld [vmem:[#allocation46_spill] sm:$0xff] }
 0x23f   : > { %2980 = vst [vmem:[%s4212_s7 + $0x18] sm:$0xff] %v2916_v37   ;;  %v2177_v15 = vpop.f32.mrf.mxu0 }
 0x240   : > { %v2045_v44 = vpop.f32.mrf.mxu3  ;;  %v1786_v55 = vpop.f32.mrf.mxu1 }
 0x241   : > { %v2113_v34 = vadd.f32 %v2045_v44, %v1981_v17  ;;  %v4724_v44 = vld [vmem:[#allocation11_spill] sm:$0xff] }
 0x242   : > { %2868 = vmatmul.msk.bf16.gmra.mxu0 %vm925_vm4, %v4720_v19  ;;  %v2646_v21 = vrot.slane %v4724_v44, 9 }
 0x243   : > { %v1915_v18 = vpop.f32.mrf.mxu2  ;;  %2814 = vmatmul.msk.bf16.gmra.mxu1 %vm925_vm4, %v4720_v19  ;;  %v4274_v12 = vadd.f32 %v2177_v15, %v2113_v34  ;;  %v1851_v15 = vadd.f32 %v1786_v55, %v4723_v50  ;;  %v837_v55 = vrot.slane %v835_v32, 4 }
 0x244   : > { %v1982_v4 = vadd.f32 %v1915_v18, %v1850_v6 }
 0x247   : > { %v2179_v24 = vpop.f32.mrf.mxu0 }
 0x248   : > { %v2047_v10 = vpop.f32.mrf.mxu3  ;;  %2835 = vmatmul.msk.bf16.gmra.mxu2 %vm925_vm4, %v4026_v30  ;;  %v1788_v39 = vpop.f32.mrf.mxu1  ;;  %v4288_v30 = vld [vmem:[%s3281_s19 + $0xd0] sm:$0xf] }
 0x249   : > { %v2114_v1 = vadd.f32 %v2047_v10, %v1982_v4  ;;  %v850_v19 = vshll.u32 %v4288_v30, 16  ;;  %v854_v17 = vshrl.u32 %v4288_v30, 16  ;;  %v1852_v6 = vadd.f32 %v1788_v39, %v4030_v49  ;;  %v255_v39 = vld [vmem:[%s3281_s19 + $0xd4] sm:$0x1] }
 0x24a   : > { %v838_v4 = vrot.slane %v4033_v11, 5  ;;  %v843_v10 = vrot.slane %v841_v40, 4  ;;  %v860_v40 = vshll.u32 %v255_v39, 16 }
 0x24b   : > { %v4276_v42 = vadd.f32 %v2179_v24, %v2114_v1  ;;  %v1918_v27 = vpop.f32.mrf.mxu2  ;;  %v836_v24 = vsel %vm3611_vm7, %v2646_v21, %v835_v32  ;;  %v856_v60 = vrot.slane %v854_v17, 4 }
 0x24c   : > { %v1983_v48 = vadd.f32 %v1918_v27, %v1851_v15  ;;  %v839_v49 = vsel %vm3611_vm7, %v837_v55, %v838_v4  ;;  %v1743_v15 = vunpack.c.l.b16 %v836_v24  ;;  %v862_v55 = vrot.slane %v860_v40, 5 }
 0x24d   : > { %v2921_v25 = vpack.c.bf16 %v4276_v42, %v4274_v12  ;;  %2852 = vmatmul.msk.bf16.gmra.mxu3 %vm925_vm4, %v3620_v53  ;;  %v844_v53 = vshll.u32 %v4285_v57, 16 }
 0x24f   : > { %2981 = vst [vmem:[%s4212_s7 + $0x20] sm:$0xff] %v2921_v25   ;;  %v2182_v38 = vpop.f32.mrf.mxu0  ;;  %v846_v1 = vrot.slane %v844_v53, 5  ;;  %v852_v25 = vrot.slane %v850_v19, 5 }
 0x250   : > { %v2050_v13 = vpop.f32.mrf.mxu3  ;;  %v1791_v37 = vpop.f32.mrf.mxu1 }
 0x251   : > { %v2115_v50 = vadd.f32 %v2050_v13, %v1983_v48  ;;  %v847_v32 = vor.u32 %v846_v1, %v843_v10  ;;  %v857_v21 = vor.u32 %v856_v60, %v852_v25  ;;  %v1853_v10 = vadd.f32 %v1791_v37, %v4047_v7 }
 0x252   : > { %2869 = vmatmul.msk.bf16.gmra.mxu0 %vm925_vm4, %v4049_v46  ;;  %v2647_v60 = vrot.slane %v4285_v57, 9 }
 0x253   : > { %v1920_v18 = vpop.f32.mrf.mxu2  ;;  %2815 = vmatmul.msk.bf16.gmra.mxu1 %vm925_vm4, %v4049_v46  ;;  %v4309_v53 = vadd.f32 %v2182_v38, %v2115_v50  ;;  %v848_v48 = vrot.slane %v847_v32, 4 }
 0x254   : > { %v1984_v34 = vadd.f32 %v1920_v18, %v1852_v6  ;;  %v1744_v6 = vunpack.c.l.b16 %v839_v49  ;;  %v858_v18 = vrot.slane %v857_v21, 4 }
 0x255   : > { %v853_v1 = vsel %vm3308_vm3, %v848_v48, %v852_v25 }
 0x256   : > { %v2007_v37 = vunpack.c.l.b16 %v853_v1 }
 0x257   : > { %v2184_v44 = vpop.f32.mrf.mxu0 }
 0x258   : > { %v2052_v27 = vpop.f32.mrf.mxu3  ;;  %2836 = vmatmul.msk.bf16.gmra.mxu2 %vm925_vm4, %v4058_v54  ;;  %v1793_v46 = vpop.f32.mrf.mxu1  ;;  %v1745_v54 = vpack.c.b16 %v1744_v6, %v1743_v15 }
 0x259   : > { %v2116_v11 = vadd.f32 %v2052_v27, %v1984_v34  ;;  %v869_v34 = vrot.slane %v4288_v30, 5  ;;  %v872_v27 = vrot.slane %v255_v39, 5 }
 0x25b   : > { %v4311_v13 = vadd.f32 %v2184_v44, %v2116_v11  ;;  %v1923_v19 = vpop.f32.mrf.mxu2  ;;  %v1854_v44 = vadd.f32 %v1793_v46, %v4061_v28  ;;  %v871_v30 = vrot.slane %v869_v34, 4  ;;  %v2896_v11 = vld [vmem:[%s3281_s19 + $0xcc] sm:$0xff]  ;;  %v870_v36 = vsel %vm3611_vm7, %v2647_v60, %v869_v34  ;;  %s2497_s19 = sshll.u32 %s2494_s11, 4  ;;  %s2498_s19 = int_to_ptr.hbm [resolvable:$true] %s2497_s19 }
 0x25c   : > { %v1985_v50 = vadd.f32 %v1923_v19, %v1853_v10  ;;  %v2139_v39 = vunpack.c.l.b16 %v870_v36  ;;  %s3081_s23 = sshra.s32 %s2498_s19, 4  ;;  %s3082_s23 = int_to_ptr.hbm [resolvable:$true] %s3081_s23 }
 0x25d   : > { %v2926_v17 = vpack.c.bf16 %v4311_v13, %v4309_v53  ;;  %2853 = vmatmul.msk.bf16.gmra.mxu3 %vm925_vm4, %v4065_v22  ;;  %v863_v22 = vsel %vm3308_vm3, %v858_v18, %v862_v55  ;;  %v873_v57 = vsel %vm3611_vm7, %v871_v30, %v872_v27  ;;  %s3083_s26 = scalar_lea.hbm %s3082_s23, 128  ;;  %p3088_p1 = scmp.lt.s32.totalorder %s3082_s23, %s4582_s2 }
 0x25e   : > { %v2008_v15 = vunpack.c.l.b16 %v863_v22  ;;  %v2140_v40 = vunpack.c.l.b16 %v873_v57  ;;  %p3084_p12 = scmp.ne.s32.totalorder %s3082_s23, %s3083_s26  ;;  %p3089_p2 = scmp.lt.s32.totalorder %s3087_s29, %s3083_s26 }
 0x25f   : > { %2982 = vst [vmem:[%s4212_s7 + $0x28] sm:$0xff] %v2926_v17   ;;  %v2187_v4 = vpop.f32.mrf.mxu0 }
 0x260   : > { %v2055_v38 = vpop.f32.mrf.mxu3  ;;  %v1796_v24 = vpop.f32.mrf.mxu1  ;;  %v2009_v21 = vpack.c.b16 %v2008_v15, %v2007_v37  ;;  %v2141_v14 = vpack.c.b16 %v2140_v40, %v2139_v39  ;;  %p3085_p13 = pnand %p3084_p12, %p3241_p4  ;;  %p3090_p3 = por %p3089_p2, %p3088_p1 }
 0x261   : > { %v2117_v6 = vadd.f32 %v2055_v38, %v1985_v50  ;;  %v1855_v38 = vadd.f32 %v1796_v24, %v4072_v58 }
 0x262   : > { %2870 = vmatmul.msk.bf16.gmra.mxu0 %vm925_vm4, %v1745_v54  ;;  %p3086_p0 = pneg %p3085_p13 }
 0x263   : > { %v1925_v49 = vpop.f32.mrf.mxu2  ;;  %2816 = vmatmul.msk.bf16.gmra.mxu1 %vm925_vm4, %v1745_v54  ;;  %v4334_v19 = vadd.f32 %v2187_v4, %v2117_v6 }
 0x264   : > { %v1986_v7 = vadd.f32 %v1925_v49, %v1854_v44  ;;  %p3091_p5 = pnand %p3090_p3, %p3086_p0 }
 0x267   : > { %v2189_v32 = vpop.f32.mrf.mxu0 }
 0x268   : > { %v2057_v25 = vpop.f32.mrf.mxu3  ;;  %2837 = vmatmul.msk.bf16.gmra.mxu2 %vm925_vm4, %v2896_v11  ;;  %v1798_v28 = vpop.f32.mrf.mxu1 }
 0x269   : > { %v2118_v46 = vadd.f32 %v2057_v25, %v1986_v7  ;;  %v1856_v10 = vadd.f32 %v1798_v28, %v4077_v31 }
 0x26b   : > { %v4336_v17 = vadd.f32 %v2189_v32, %v2118_v46  ;;  %v1928_v54 = vpop.f32.mrf.mxu2 }
 0x26c   : > { %v1987_v4 = vadd.f32 %v1928_v54, %v1855_v38 }
 0x26d   : > { %v2931_v48 = vpack.c.bf16 %v4336_v17, %v4334_v19  ;;  %2854 = vmatmul.msk.bf16.gmra.mxu3 %vm925_vm4, %v2009_v21 }
 0x26f   : > { %2983 = vst [vmem:[%s4212_s7 + $0x30] sm:$0xff] %v2931_v48   ;;  %v2192_v18 = vpop.f32.mrf.mxu0 }
 0x270   : > { %v2060_v55 = vpop.f32.mrf.mxu3  ;;  %v1801_v34 = vpop.f32.mrf.mxu1 }
 0x271   : > { %v2119_v60 = vadd.f32 %v2060_v55, %v1987_v4  ;;  %v1857_v15 = vadd.f32 %v1801_v34, %v4086_v16 }
 0x272   : > { %2871 = vmatmul.msk.bf16.gmra.mxu0 %vm925_vm4, %v2141_v14 }
 0x273   : > { %v1930_v1 = vpop.f32.mrf.mxu2  ;;  %v4345_v27 = vadd.f32 %v2192_v18, %v2119_v60 }
 0x274   : > { %v1988_v22 = vadd.f32 %v1930_v1, %v1856_v10 }
 0x277   : > { %v2194_v50 = vpop.f32.mrf.mxu0 }
 0x278   : > { %v2062_v44 = vpop.f32.mrf.mxu3  ;;  %v1803_v49 = vpop.f32.mrf.mxu1 }
 0x279   : > { %v2120_v30 = vadd.f32 %v2062_v44, %v1988_v22  ;;  %v1858_v32 = vadd.f32 %v1803_v49, %v4091_v26 }
 0x27b   : > { %v4347_v11 = vadd.f32 %v2194_v50, %v2120_v30  ;;  %v1933_v7 = vpop.f32.mrf.mxu2 }
 0x27c   : > { %v1989_v6 = vadd.f32 %v1933_v7, %v1857_v15 }
 0x27d   : > { %v2936_v58 = vpack.c.bf16 %v4347_v11, %v4345_v27 }
 0x27f   : > { %2984 = vst [vmem:[%s4212_s7 + $0x38] sm:$0xff] %v2936_v58   ;;  %v2197_v24 = vpop.f32.mrf.mxu0 }
 0x280   : > { %v2065_v37 = vpop.f32.mrf.mxu3  ;;  %v1806_v31 = vpop.f32.mrf.mxu1 }
 0x281   : > { %v2121_v25 = vadd.f32 %v2065_v37, %v1989_v6  ;;  %v1859_v55 = vadd.f32 %v1806_v31, %v4100_v59 }
 0x283   : > { %v1935_v36 = vpop.f32.mrf.mxu2  ;;  %v4354_v40 = vadd.f32 %v2197_v24, %v2121_v25 }
 0x284   : > { %v1990_v57 = vadd.f32 %v1935_v36, %v1858_v32 }
 0x287   : > { %v2199_v28 = vpop.f32.mrf.mxu0 }
 0x288   : > { %v2067_v46 = vpop.f32.mrf.mxu3  ;;  %v1808_v21 = vpop.f32.mrf.mxu1 }
 0x289   : > { %v2122_v39 = vadd.f32 %v2067_v46, %v1990_v57  ;;  %v1860_v38 = vadd.f32 %v1808_v21, %v4105_v47  ;;  %v2333_v46 = vadd.f32 %v4206_v35, %v4204_v9 }
 0x28b   : > { %v4356_v54 = vadd.f32 %v2199_v28, %v2122_v39  ;;  %v1938_v48 = vpop.f32.mrf.mxu2  ;;  %v2334_v39 = vadd.f32 %v2333_v46, %v4223_v62 }
 0x28c   : > { %v1991_v34 = vadd.f32 %v1938_v48, %v1859_v55 }
 0x28d   : > { %v2941_v14 = vpack.c.bf16 %v4356_v54, %v4354_v40 }
 0x28f   : > { %2985 = vst [vmem:[%s4212_s7 + $0x40] sm:$0xff] %v2941_v14   ;;  %v2202_v16 = vpop.f32.mrf.mxu0 }
 0x290   : > { %v2070_v18 = vpop.f32.mrf.mxu3  ;;  %v1811_v26 = vpop.f32.mrf.mxu1 }
 0x291   : > { %v2123_v1 = vadd.f32 %v2070_v18, %v1991_v34  ;;  %v1861_v47 = vadd.f32 %v1811_v26, %v4114_v23 }
 0x293   : > { %v1940_v4 = vpop.f32.mrf.mxu2  ;;  %v4363_v49 = vadd.f32 %v2202_v16, %v2123_v1 }
 0x294   : > { %v1992_v10 = vadd.f32 %v1940_v4, %v1860_v38 }
 0x297   : > { %v2204_v22 = vpop.f32.mrf.mxu0 }
 0x298   : > { %v2072_v60 = vpop.f32.mrf.mxu3  ;;  %v1813_v50 = vpop.f32.mrf.mxu1 }
 0x299   : > { %v2124_v44 = vadd.f32 %v2072_v60, %v1992_v10  ;;  %v1862_v15 = vadd.f32 %v1813_v50, %v4119_v61  ;;  %v2335_v61 = vadd.f32 %v2334_v39, %v4225_v5 }
 0x29b   : > { %v4365_v30 = vadd.f32 %v2204_v22, %v2124_v44  ;;  %v1943_v7 = vpop.f32.mrf.mxu2  ;;  %v2336_v18 = vadd.f32 %v2335_v61, %v4240_v33 }
 0x29c   : > { %v1993_v31 = vadd.f32 %v1943_v7, %v1861_v47 }
 0x29d   : > { %v2946_v58 = vpack.c.bf16 %v4365_v30, %v4363_v49  ;;  %v2337_v38 = vadd.f32 %v2336_v18, %v4242_v3 }
 0x29f   : > { %2986 = vst [vmem:[%s4212_s7 + $0x48] sm:$0xff] %v2946_v58   ;;  %v2207_v59 = vpop.f32.mrf.mxu0  ;;  %v2338_v10 = vadd.f32 %v2337_v38, %v4257_v41 }
 0x2a0   : > { %v2075_v24 = vpop.f32.mrf.mxu3  ;;  %v1816_v37 = vpop.f32.mrf.mxu1 }
 0x2a1   : > { %v2125_v36 = vadd.f32 %v2075_v24, %v1993_v31  ;;  %v1863_v4 = vadd.f32 %v1816_v37, %v4128_v56  ;;  %v2339_v50 = vadd.f32 %v2338_v10, %v4259_v43 }
 0x2a3   : > { %v1945_v6 = vpop.f32.mrf.mxu2  ;;  %v4375_v48 = vadd.f32 %v2207_v59, %v2125_v36  ;;  %v2340_v7 = vadd.f32 %v2339_v50, %v4274_v12 }
 0x2a4   : > { %v1994_v32 = vadd.f32 %v1945_v6, %v1862_v15 }
 0x2a5   : > { %v2341_v31 = vadd.f32 %v2340_v7, %v4276_v42 }
 0x2a7   : > { %v2209_v57 = vpop.f32.mrf.mxu0  ;;  %v2342_v56 = vadd.f32 %v2341_v31, %v4309_v53 }
 0x2a8   : > { %v2077_v25 = vpop.f32.mrf.mxu3  ;;  %v1818_v28 = vpop.f32.mrf.mxu1 }
 0x2a9   : > { %v2126_v21 = vadd.f32 %v2077_v25, %v1994_v32  ;;  %v1864_v22 = vadd.f32 %v1818_v28, %v4133_v0  ;;  %v2343_v32 = vadd.f32 %v2342_v56, %v4311_v13 }
 0x2ab   : > { %v4377_v14 = vadd.f32 %v2209_v57, %v2126_v21  ;;  %v1948_v23 = vpop.f32.mrf.mxu2  ;;  %v2344_v57 = vadd.f32 %v2343_v32, %v4334_v19 }
 0x2ac   : > { %v1995_v1 = vadd.f32 %v1948_v23, %v1863_v4 }
 0x2ad   : > { %v2951_v16 = vpack.c.bf16 %v4377_v14, %v4375_v48  ;;  %v2345_v21 = vadd.f32 %v2344_v57, %v4336_v17 }
 0x2af   : > { %2987 = vst [vmem:[%s4212_s7 + $0x50] sm:$0xff] %v2951_v16   ;;  %v2212_v26 = vpop.f32.mrf.mxu0  ;;  %v2346_v23 = vadd.f32 %v2345_v21, %v4345_v27 }
 0x2b0   : > { %v2080_v55 = vpop.f32.mrf.mxu3  ;;  %v1821_v34 = vpop.f32.mrf.mxu1 }
 0x2b1   : > { %v2127_v58 = vadd.f32 %v2080_v55, %v1995_v1  ;;  %v1865_v39 = vadd.f32 %v1821_v34, %v4142_v29 }
 0x2b3   : > { %v1950_v60 = vpop.f32.mrf.mxu2  ;;  %v4392_v37 = vadd.f32 %v2212_v26, %v2127_v58  ;;  %v2347_v26 = vadd.f32 %v2346_v23, %v4347_v11 }
 0x2b4   : > { %v1996_v44 = vadd.f32 %v1950_v60, %v1864_v22 }
 0x2b5   : > { %v2348_v38 = vadd.f32 %v2347_v26, %v4354_v40 }
 0x2b7   : > { %v2214_v59 = vpop.f32.mrf.mxu0  ;;  %v2349_v60 = vadd.f32 %v2348_v38, %v4356_v54 }
 0x2b8   : > { %v2082_v24 = vpop.f32.mrf.mxu3  ;;  %v1823_v47 = vpop.f32.mrf.mxu1 }
 0x2b9   : > { %v2128_v15 = vadd.f32 %v2082_v24, %v1996_v44  ;;  %v1866_v16 = vadd.f32 %v1823_v47, %v4147_v52  ;;  %v2350_v29 = vadd.f32 %v2349_v60, %v4363_v49 }
 0x2bb   : > { %v4394_v6 = vadd.f32 %v2214_v59, %v2128_v15  ;;  %v1953_v0 = vpop.f32.mrf.mxu2  ;;  %v2351_v7 = vadd.f32 %v2350_v29, %v4365_v30 }
 0x2bc   : > { %v1997_v61 = vadd.f32 %v1953_v0, %v1865_v39 }
 0x2bd   : > { %v2956_v36 = vpack.c.bf16 %v4394_v6, %v4392_v37  ;;  %v2352_v24 = vadd.f32 %v2351_v7, %v4375_v48 }
 0x2bf   : > { %2988 = vst [vmem:[%s4212_s7 + $0x58] sm:$0xff] %v2956_v36   ;;  %v2217_v25 = vpop.f32.mrf.mxu0  ;;  %v2353_v56 = vadd.f32 %v2352_v24, %v4377_v14 }
 0x2c0   : > { %v2085_v28 = vpop.f32.mrf.mxu3  ;;  %v1826_v46 = vpop.f32.mrf.mxu1 }
 0x2c1   : > { %v2129_v4 = vadd.f32 %v2085_v28, %v1997_v61  ;;  %v1867_v59 = vadd.f32 %v1826_v46, %v4156_v20  ;;  %v2354_v32 = vadd.f32 %v2353_v56, %v4392_v37 }
 0x2c3   : > { %v1955_v18 = vpop.f32.mrf.mxu2  ;;  %v4409_v34 = vadd.f32 %v2217_v25, %v2129_v4  ;;  %v2355_v28 = vadd.f32 %v2354_v32, %v4394_v6 }
 0x2c4   : > { %v1998_v55 = vadd.f32 %v1955_v18, %v1866_v16 }
 0x2c5   : > { %v2356_v20 = vadd.f32 %v2355_v28, %v4409_v34 }
 0x2c7   : > { %v2219_v10 = vpop.f32.mrf.mxu0 }
 0x2c8   : > { %v2087_v1 = vpop.f32.mrf.mxu3  ;;  %v1828_v22 = vpop.f32.mrf.mxu1 }
 0x2c9   : > { %v2130_v50 = vadd.f32 %v2087_v1, %v1998_v55  ;;  %v1868_v57 = vadd.f32 %v1828_v22, %v4161_v8 }
 0x2cb   : > { %v4411_v44 = vadd.f32 %v2219_v10, %v2130_v50  ;;  %v1958_v52 = vpop.f32.mrf.mxu2 }
 0x2cc   : > { %v1999_v31 = vadd.f32 %v1958_v52, %v1867_v59 }
 0x2cd   : > { %v2961_v58 = vpack.c.bf16 %v4411_v44, %v4409_v34  ;;  %v2357_v61 = vadd.f32 %v2356_v20, %v4411_v44 }
 0x2cf   : > { %2989 = vst [vmem:[%s4212_s7 + $0x60] sm:$0xff] %v2961_v58   ;;  %v2222_v47 = vpop.f32.mrf.mxu0 }
 0x2d0   : > { %v2090_v15 = vpop.f32.mrf.mxu3  ;;  %v1831_v0 = vpop.f32.mrf.mxu1 }
 0x2d1   : > { %v2131_v36 = vadd.f32 %v2090_v15, %v1999_v31  ;;  %v1869_v8 = vadd.f32 %v1831_v0, %v4170_v51 }
 0x2d3   : > { %v1960_v25 = vpop.f32.mrf.mxu2  ;;  %v4424_v46 = vadd.f32 %v2222_v47, %v2131_v36 }
 0x2d4   : > { %v2000_v21 = vadd.f32 %v1960_v25, %v1868_v57 }
 0x2d5   : > { %v2358_v18 = vadd.f32 %v2357_v61, %v4424_v46 }
 0x2d7   : > { %v2224_v39 = vpop.f32.mrf.mxu0 }
 0x2d8   : > { %v2092_v23 = vpop.f32.mrf.mxu3  ;;  %v1833_v38 = vpop.f32.mrf.mxu1 }
 0x2d9   : > { %v2132_v16 = vadd.f32 %v2092_v23, %v2000_v21  ;;  %v1870_v52 = vadd.f32 %v1833_v38, %v4175_v63 }
 0x2db   : > { %v4428_v26 = vadd.f32 %v2224_v39, %v2132_v16  ;;  %v1963_v55 = vpop.f32.mrf.mxu2 }
 0x2dc   : > { %v2001_v1 = vadd.f32 %v1963_v55, %v1869_v8 }
 0x2dd   : > { %v2966_v4 = vpack.c.bf16 %v4428_v26, %v4424_v46  ;;  %v2359_v10 = vadd.f32 %v2358_v18, %v4428_v26 }
 0x2df   : > { %2990 = vst [vmem:[%s4212_s7 + $0x68] sm:$0xff] %v2966_v4   ;;  %v2227_v22 = vpop.f32.mrf.mxu0 }
 0x2e0   : > { %v2095_v60 = vpop.f32.mrf.mxu3  ;;  %v1836_v59 = vpop.f32.mrf.mxu1 }
 0x2e1   : > { %v2133_v50 = vadd.f32 %v2095_v60, %v2001_v1  ;;  %v1871_v56 = vadd.f32 %v1836_v59, %v4184_v2 }
 0x2e3   : > { %v4435_v29 = vadd.f32 %v2227_v22, %v2133_v50  ;;  %v1965_v7 = vpop.f32.mrf.mxu2 }
 0x2e4   : > { %v2002_v58 = vadd.f32 %v1965_v7, %v1870_v52 }
 0x2e5   : > { %v2360_v51 = vadd.f32 %v2359_v10, %v4435_v29 }
 0x2e7   : > { %v2229_v24 = vpop.f32.mrf.mxu0 }
 0x2e8   : > { %v2097_v47 = vpop.f32.mrf.mxu3  ;;  %v1838_v57 = vpop.f32.mrf.mxu1 }
 0x2e9   : > { %v2134_v31 = vadd.f32 %v2097_v47, %v2002_v58  ;;  %v1872_v39 = vadd.f32 %v1838_v57, %v4188_v45 }
 0x2eb   : > { %v4439_v15 = vadd.f32 %v2229_v24, %v2134_v31  ;;  %v1968_v0 = vpop.f32.mrf.mxu2 }
 0x2ec   : > { %v2003_v63 = vadd.f32 %v1968_v0, %v1871_v56 }
 0x2ed   : > { %v2971_v32 = vpack.c.bf16 %v4439_v15, %v4435_v29  ;;  %v2361_v36 = vadd.f32 %v2360_v51, %v4439_v15 }
 0x2ef   : > { %2991 = vst [vmem:[%s4212_s7 + $0x70] sm:$0xff] %v2971_v32   ;;  %v2232_v25 = vpop.f32.mrf.mxu0 }
 0x2f0   : > { %v2100_v28 = vpop.f32.mrf.mxu3 }
 0x2f1   : > { %v2135_v21 = vadd.f32 %v2100_v28, %v2003_v63 }
 0x2f3   : > { %v4446_v20 = vadd.f32 %v2232_v25, %v2135_v21  ;;  %v1970_v23 = vpop.f32.mrf.mxu2 }
 0x2f4   : > { %v2004_v61 = vadd.f32 %v1970_v23, %v1872_v39 }
 0x2f5   : > { %v2362_v2 = vadd.f32 %v2361_v36, %v4446_v20 }
 0x2f7   : > { %v2234_v8 = vpop.f32.mrf.mxu0 }
 0x2f8   : > { %v2102_v16 = vpop.f32.mrf.mxu3 }
 0x2f9   : > { %v2136_v18 = vadd.f32 %v2102_v16, %v2004_v61 }
 0x2fb   : > { %v4455_v55 = vadd.f32 %v2234_v8, %v2136_v18 }
 0x2fd   : > { %v2976_v45 = vpack.c.bf16 %v4455_v55, %v4446_v20  ;;  %v2363_v38 = vadd.f32 %v2362_v2, %v4455_v55 }
 0x2ff   : > { %2992 = vst [vmem:[%s4212_s7 + $0x78] sm:$0xff] %v2976_v45   ;;  %v2364_v4 = vrot.slane %v2363_v38, 4 }
 0x300   : > { %3094 = shalt.err (!%p3091_p5)
}
 0x301   : > { %s3179_s6 = smov 64   ;;  %s3180_s7 = smov 4   ;;  %v2365_v10 = vadd.f32 %v2364_v4, %v2363_v38  ;;  %vm2472_vm8 = vcmask 1040384  }
 0x302   : > { %2997 = dma.vmem_to_hbm [thread:$0]  (%p3241_p4), %s2496_s18, 2048, %s2498_s19, %s2476_s21, %s3179_s6, %s3179_s6, %s3180_s7  }
 0x303   : > { %v2366_v1 = vrot.slane %v2365_v10, 2  ;;  %s2628_s8 = sshll.u32 %s4199_s5, 1  ;;  %s2876_s9 = sshll.u32 %s3169_s15, 1 }
 0x304   : > { %s2511_s18 = scalar_lea.hbm %s4583_s3, %s2876_s9  ;;  %s190_s19 = scalar_lea.vmem [#allocation4], %s2628_s8 }
 0x305   : > { %v2367_v22 = vadd.f32 %v2366_v1, %v2365_v10  ;;  %s2513_s21 = sshll.u32 %s190_s19, 4  ;;  %s2515_s23 = sshll.u32 %s2511_s18, 4  ;;  %s2514_s21 = int_to_ptr.vmem [resolvable:$true] %s2513_s21  ;;  %s2516_s23 = int_to_ptr.hbm [resolvable:$true] %s2515_s23 }
 0x306   : > { %s2481_s26 = scalar_lea.sflag [#allocation5], %s4199_s5  ;;  %s3109_s15 = sshra.s32 %s2516_s23, 4  ;;  %s3110_s15 = int_to_ptr.hbm [resolvable:$true] %s3109_s15 }
 0x307   : > { %v2368_v60 = vrot.slane %v2367_v22, 1  ;;  %s3111_s27 = scalar_lea.hbm %s3110_s15, 2  ;;  %s3115_s30 = scalar_lea.hbm %s4583_s3, 4 }
 0x308   : > { %p3112_p6 = scmp.ne.s32.totalorder %s3110_s15, %s3111_s27  ;;  %p3116_p10 = scmp.lt.s32.totalorder %s3110_s15, %s4583_s3 }
 0x309   : > { %v4472_v50 = vadd.f32 %v2368_v60, %v2367_v22  ;;  %p3117_p11 = scmp.lt.s32.totalorder %s3115_s30, %s3111_s27 }
 0x30a   : > { %p3113_p7 = pnand %p3112_p6, %p3241_p4 }
 0x30b   : > { %v4475_v52 = vmul.f32 0.00390625, %v4472_v50  ;;  %p3118_p12 = por %p3117_p11, %p3116_p10 }
 0x30c   : > { %p3114_p9 = pneg %p3113_p7 }
 0x30d   : > { %v2371_v7 = vsub.f32 %v4204_v9, %v4475_v52  ;;  %v2372_v51 = vsub.f32 %v4206_v35, %v4475_v52  ;;  %v2373_v58 = vsub.f32 %v4223_v62, %v4475_v52  ;;  %v2374_v47 = vsub.f32 %v4225_v5, %v4475_v52 }
 0x30e   : > { %v2375_v31 = vsub.f32 %v4240_v33, %v4475_v52  ;;  %v2376_v32 = vsub.f32 %v4242_v3, %v4475_v52  ;;  %v2377_v35 = vsub.f32 %v4257_v41, %v4475_v52  ;;  %v2378_v57 = vsub.f32 %v4259_v43, %v4475_v52  ;;  %p3119_p13 = pnand %p3118_p12, %p3114_p9 }
 0x30f   : > { %v2403_v59 = vmul.f32 %v2371_v7, %v2371_v7  ;;  %v2404_v24 = vmul.f32 %v2372_v51, %v2372_v51  ;;  %v2405_v56 = vmul.f32 %v2373_v58, %v2373_v58  ;;  %v2406_v9 = vmul.f32 %v2374_v47, %v2374_v47 }
 0x310   : > { %v2407_v63 = vmul.f32 %v2375_v31, %v2375_v31  ;;  %v2408_v25 = vmul.f32 %v2376_v32, %v2376_v32  ;;  %v2379_v33 = vsub.f32 %v4274_v12, %v4475_v52  ;;  %v2409_v28 = vmul.f32 %v2377_v35, %v2377_v35 }
 0x311   : > { %v2435_v0 = vadd.f32 %v2404_v24, %v2403_v59  ;;  %v2380_v3 = vsub.f32 %v4276_v42, %v4475_v52  ;;  %v2410_v39 = vmul.f32 %v2378_v57, %v2378_v57  ;;  %v2381_v41 = vsub.f32 %v4309_v53, %v4475_v52 }
 0x312   : > { %v2411_v2 = vmul.f32 %v2379_v33, %v2379_v33  ;;  %v2382_v43 = vsub.f32 %v4311_v13, %v4475_v52  ;;  %v2383_v12 = vsub.f32 %v4334_v19, %v4475_v52  ;;  %v2384_v42 = vsub.f32 %v4336_v17, %v4475_v52 }
 0x313   : > { %v2436_v36 = vadd.f32 %v2435_v0, %v2405_v56  ;;  %v2412_v16 = vmul.f32 %v2380_v3, %v2380_v3  ;;  %v2413_v8 = vmul.f32 %v2381_v41, %v2381_v41  ;;  %v2385_v53 = vsub.f32 %v4345_v27, %v4475_v52 }
 0x314   : > { %v2414_v38 = vmul.f32 %v2382_v43, %v2382_v43  ;;  %v2415_v10 = vmul.f32 %v2383_v12, %v2383_v12  ;;  %v2386_v13 = vsub.f32 %v4347_v11, %v4475_v52  ;;  %v2416_v22 = vmul.f32 %v2384_v42, %v2384_v42 }
 0x315   : > { %v2437_v62 = vadd.f32 %v2436_v36, %v2406_v9  ;;  %v2387_v19 = vsub.f32 %v4354_v40, %v4475_v52  ;;  %v2417_v7 = vmul.f32 %v2385_v53, %v2385_v53  ;;  %v2388_v17 = vsub.f32 %v4356_v54, %v4475_v52 }
 0x316   : > { %v2418_v58 = vmul.f32 %v2386_v13, %v2386_v13  ;;  %v2389_v27 = vsub.f32 %v4363_v49, %v4475_v52  ;;  %v2390_v11 = vsub.f32 %v4365_v30, %v4475_v52  ;;  %v2391_v40 = vsub.f32 %v4375_v48, %v4475_v52 }
 0x317   : > { %v2438_v5 = vadd.f32 %v2437_v62, %v2407_v63  ;;  %v2419_v24 = vmul.f32 %v2387_v19, %v2387_v19  ;;  %v2420_v31 = vmul.f32 %v2388_v17, %v2388_v17  ;;  %v2392_v54 = vsub.f32 %v4377_v14, %v4475_v52 }
 0x318   : > { %v2421_v0 = vmul.f32 %v2389_v27, %v2389_v27  ;;  %v2422_v9 = vmul.f32 %v2390_v11, %v2390_v11  ;;  %v2393_v49 = vsub.f32 %v4392_v37, %v4475_v52  ;;  %v2423_v35 = vmul.f32 %v2391_v40, %v2391_v40 }
 0x319   : > { %v2439_v21 = vadd.f32 %v2438_v5, %v2408_v25  ;;  %v2394_v30 = vsub.f32 %v4394_v6, %v4475_v52  ;;  %v2424_v62 = vmul.f32 %v2392_v54, %v2392_v54  ;;  %v2395_v48 = vsub.f32 %v4409_v34, %v4475_v52 }
 0x31a   : > { %v2425_v25 = vmul.f32 %v2393_v49, %v2393_v49  ;;  %v2396_v14 = vsub.f32 %v4411_v44, %v4475_v52  ;;  %v2397_v37 = vsub.f32 %v4424_v46, %v4475_v52  ;;  %v2398_v6 = vsub.f32 %v4428_v26, %v4475_v52 }
 0x31b   : > { %v2440_v23 = vadd.f32 %v2439_v21, %v2409_v28  ;;  %v2426_v33 = vmul.f32 %v2394_v30, %v2394_v30  ;;  %v2427_v21 = vmul.f32 %v2395_v48, %v2395_v48  ;;  %v2399_v34 = vsub.f32 %v4435_v29, %v4475_v52 }
 0x31c   : > { %v2429_v41 = vmul.f32 %v2397_v37, %v2397_v37  ;;  %v2400_v44 = vsub.f32 %v4439_v15, %v4475_v52  ;;  %v2401_v46 = vsub.f32 %v4446_v20, %v4475_v52  ;;  %v2402_v26 = vsub.f32 %v4455_v55, %v4475_v52 }
 0x31d   : > { %v2441_v61 = vadd.f32 %v2440_v23, %v2410_v39  ;;  %v2428_v39 = vmul.f32 %v2396_v14, %v2396_v14 }
 0x31e   : > { %v2432_v12 = vmul.f32 %v2400_v44, %v2400_v44  ;;  %v2433_v29 = vmul.f32 %v2401_v46, %v2401_v46  ;;  %v2434_v42 = vmul.f32 %v2402_v26, %v2402_v26 }
 0x31f   : > { %v2442_v18 = vadd.f32 %v2441_v61, %v2411_v2  ;;  %v2430_v61 = vmul.f32 %v2398_v6, %v2398_v6 }
 0x321   : > { %v2443_v45 = vadd.f32 %v2442_v18, %v2412_v16  ;;  %v2431_v16 = vmul.f32 %v2399_v34, %v2399_v34 }
 0x323   : > { %v2444_v4 = vadd.f32 %v2443_v45, %v2413_v8 }
 0x325   : > { %v2445_v1 = vadd.f32 %v2444_v4, %v2414_v38 }
 0x327   : > { %v2446_v60 = vadd.f32 %v2445_v1, %v2415_v10 }
 0x329   : > { %v2447_v51 = vadd.f32 %v2446_v60, %v2416_v22 }
 0x32b   : > { %v2448_v59 = vadd.f32 %v2447_v51, %v2417_v7 }
 0x32d   : > { %v2449_v47 = vadd.f32 %v2448_v59, %v2418_v58 }
 0x32f   : > { %v2450_v56 = vadd.f32 %v2449_v47, %v2419_v24 }
 0x331   : > { %v2451_v32 = vadd.f32 %v2450_v56, %v2420_v31 }
 0x333   : > { %v2452_v36 = vadd.f32 %v2451_v32, %v2421_v0 }
 0x335   : > { %v2453_v63 = vadd.f32 %v2452_v36, %v2422_v9 }
 0x337   : > { %v2454_v57 = vadd.f32 %v2453_v63, %v2423_v35 }
 0x339   : > { %v2455_v5 = vadd.f32 %v2454_v57, %v2424_v62 }
 0x33b   : > { %v2456_v28 = vadd.f32 %v2455_v5, %v2425_v25 }
 0x33d   : > { %v2457_v3 = vadd.f32 %v2456_v28, %v2426_v33 }
 0x33f   : > { %v2458_v23 = vadd.f32 %v2457_v3, %v2427_v21 }
 0x341   : > { %v2459_v2 = vadd.f32 %v2458_v23, %v2428_v39 }
 0x343   : > { %v2460_v43 = vadd.f32 %v2459_v2, %v2429_v41 }
 0x345   : > { %v2461_v18 = vadd.f32 %v2460_v43, %v2430_v61 }
 0x347   : > { %v2462_v8 = vadd.f32 %v2461_v18, %v2431_v16 }
 0x349   : > { %v2463_v45 = vadd.f32 %v2462_v8, %v2432_v12 }
 0x34b   : > { %v2464_v38 = vadd.f32 %v2463_v45, %v2433_v29 }
 0x34d   : > { %v2465_v4 = vadd.f32 %v2464_v38, %v2434_v42 }
 0x34f   : > { %v2466_v15 = vrot.slane %v2465_v4, 4 }
 0x351   : > { %v2467_v53 = vadd.f32 %v2466_v15, %v2465_v4 }
 0x353   : > { %v2468_v10 = vrot.slane %v2467_v53, 2 }
 0x355   : > { %v2469_v20 = vadd.f32 %v2468_v10, %v2467_v53 }
 0x357   : > { %v2470_v55 = vrot.slane %v2469_v20, 1 }
 0x359   : > { %v2471_v52 = vadd.f32 %v2470_v55, %v2469_v20 }
 0x35b   : > { %v2473_v1 = vsel %vm2472_vm8, %v4472_v50, %v2471_v52 }
 0x35c   : > { %2474 = vst [vmem:[%s190_s19] sm:$0x3] %v2473_v1 }
 0x35d   : > { %3122 = shalt.err (!%p3119_p13)
}
 0x35e   : > { %2998 = dma.vmem_to_hbm [thread:$0]  (%p3241_p4), %s2514_s21, 32, %s2516_s23, %s2481_s26  }
 0x35f PF: > { %p3008_p0 = scmp.ge.s32.totalorder %s3177_s17, 2  ;;  %s2527_s5 = sand.u32 1, %s3157_s12  }
 0x360   : > { %s2528_s7 = scalar_lea.sflag [#allocation3], %s2527_s5 }
 0x361   : > { %p3002_p1 = pnand %p3008_p0, %p3248_p8 }
 0x363   : > { %p3003_p2 = pneg %p3002_p1 }
 0x365   : > { %3148 = dma.done.wait (%p3003_p2), %s2528_s7, 2048  }
 0x366   : > { %3150 = vsyncadd (%p3003_p2), %s2528_s7, 4294965248  ;;  %s2538_s8 = scalar_lea.sflag [#allocation5], %s2527_s5 }
 0x367   : > { %3152 = dma.done.wait (%p3003_p2), %s2538_s8, 32  }
 0x368   : > { %3154 = vsyncadd (%p3003_p2), %s2538_s8, 4294967264  ;;  %s20_s17 = sadd.s32 1, %s3177_s17   ;;  %s4725_s12 = smov %s3161_s13 }
 0x369   : > { %p17_p3 = scmp.ge.s32.totalorder %s20_s17, 4   ;;  %s4726_s13 = smov %s3165_s14 }
 0x36a   : > { %s4727_s14 = smov %s3254_s25  ;;  %s4728_s15 = smov %s3173_s16 }
 0x36b   : > { %s4729_s16 = smov %s4731_s20  ;;  %19 = sbr.rel (!%p17_p3) target bundleno = 6 (0x6), region = 89 }
 0x370   :  { %2544 = vsyncpa [#allocation3], 1 }
 0x371   :  { %2546 = vsyncpa [#allocation3 + $0x1], 1 }
 0x372   :  { %2547 = vsyncpa [#allocation5], 1 }
 0x373   :  { %2549 = vsyncpa [#allocation5 + $0x1], 1 }

</bundles_post_ra>
